<compile_context>
chip_gen: v6e
topology: v6e:2x2x1
jax: 0.10.0
libtpu: 0.0.40
codegen_flags: <defaults>
</compile_context>

<pallas_src>
import jax
import jax.numpy as jnp
from jax import lax
from jax.experimental import pallas as pl
from jax.experimental.pallas import tpu as pltpu


# ----------------------------------------------------------------------------
# Pallas kernel: fused  out = relu(W @ A + shift)
#   w: (C, K) bf16 (BN scale pre-folded), a: (K, tile) bf16,
#   t: (C, 1) f32 shift, out block: (C, tile)  -- lane axis = pixel tile.
# ----------------------------------------------------------------------------
def _matmul_bias_relu_kernel(w_ref, a_ref, t_ref, o_ref):
    acc = jnp.dot(w_ref[...], a_ref[...], preferred_element_type=jnp.float32)
    o_ref[...] = jnp.maximum(acc + t_ref[...], 0.0).astype(o_ref.dtype)


def _pick_tile(m_padded, max_tile=1024):
    tile = 128
    for cand in range(128, min(m_padded, max_tile) + 1, 128):
        if m_padded % cand == 0:
            tile = cand
    # keep at least 2 parallel grid steps (v7x has 2 TensorCores per chip)
    if tile == m_padded and m_padded >= 256 and (m_padded // 2) % 128 == 0:
        tile = m_padded // 2
    return tile


def matmul_bias_relu(w, a, t, *, out_dtype):
    """out[c, m] = relu(sum_k w[c,k] * a[k,m] + t[c,0]); lane axis is m."""
    c, k = w.shape
    m = a.shape[1]
    m_pad = (m + 127) // 128 * 128
    if m_pad != m:
        a = jnp.pad(a, ((0, 0), (0, m_pad - m)))
    tile = _pick_tile(m_pad)
    out = pl.pallas_call(
        _matmul_bias_relu_kernel,
        out_shape=jax.ShapeDtypeStruct((c, m_pad), out_dtype),
        grid=(m_pad // tile,),
        in_specs=[
            pl.BlockSpec((c, k), lambda i: (0, 0)),      # weights: resident
            pl.BlockSpec((k, tile), lambda i: (0, i)),   # activation patches
            pl.BlockSpec((c, 1), lambda i: (0, 0)),      # folded-BN shift
        ],
        out_specs=pl.BlockSpec((c, tile), lambda i: (0, i)),
        compiler_params=pltpu.CompilerParams(
            dimension_semantics=("parallel",)),
    )(w, a, t)
    return out[:, :m] if m_pad != m else out


# ----------------------------------------------------------------------------
# Forward pass of CenterNetDecoderUnit (eval-mode BN, folded)
# ----------------------------------------------------------------------------
def centernet_decoder_unit_forward(x_nchw, p):
    eps = 1e-5
    N, Cin, H, W = x_nchw.shape
    Cout = p["w1"].shape[0]
    M = N * H * W
    cdt = jnp.bfloat16  # MXU-native operand dtype

    # fold BatchNorm (running stats) + conv bias into per-channel (scale, shift)
    s1 = p["g1"] / jnp.sqrt(p["v1"] + eps)
    t1 = (p["b1"] - p["m1"]) * s1 + p["be1"]
    s2 = p["g2"] / jnp.sqrt(p["v2"] + eps)
    t2 = p["be2"] - p["m2"] * s2

    # --- stage 1: 3x3 conv (stride 1, pad 1) + BN + ReLU, channels-first -----
    xp = jnp.pad(x_nchw, ((0, 0), (0, 0), (1, 1), (1, 1)))
    taps = [xp[:, :, dy:dy + H, dx:dx + W] for dy in range(3) for dx in range(3)]
    a1 = jnp.stack(taps, axis=0)                              # (9, N, Cin, H, W)
    a1 = jnp.transpose(a1, (0, 2, 1, 3, 4)).reshape(9 * Cin, M)
    w1m = jnp.transpose(p["w1"], (0, 2, 3, 1)).reshape(Cout, 9 * Cin)
    w1f = (w1m * s1[:, None]).astype(cdt)                     # BN scale folded
    y = matmul_bias_relu(w1f, a1.astype(cdt),
                         t1[:, None].astype(jnp.float32), out_dtype=cdt)
    y = y.reshape(Cout, N, H, W)                              # channels-first

    # --- stage 2: ConvTranspose2d(4, s=2, p=1) + BN + ReLU, parity-fused -----
    # out[n, co, 2i+py, 2j+px] = sum_{ry,rx,ci} yp[ci, n, i+ry, j+rx] *
    #     Wt[ky, kx, ci, co]  with ky = 3-py-2*(ry-py), kx = 3-px-2*(rx-px),
    #     valid only when (ry-py, rx-px) in {0,1}^2 (zero otherwise).
    yp = jnp.pad(y, ((0, 0), (0, 0), (1, 1), (1, 1)))
    taps2 = [yp[:, :, ry:ry + H, rx:rx + W] for ry in range(3) for rx in range(3)]
    a2 = jnp.stack(taps2, axis=0).reshape(9 * Cout, M)        # rows = (tap, ci)

    wt_k = jnp.transpose(p["wt"], (2, 3, 1, 0))               # (kH, kW, co, ci)
    zeros = jnp.zeros((Cout, Cout), wt_k.dtype)
    rows = []
    for py in range(2):
        for px in range(2):
            blks = []
            for ry in range(3):
                for rx in range(3):
                    dy, dx = ry - py, rx - px
                    if dy in (0, 1) and dx in (0, 1):
                        blks.append(wt_k[3 - py - 2 * dy, 3 - px - 2 * dx])
                    else:
                        blks.append(zeros)
            rows.append(jnp.concatenate(blks, axis=1))        # (Cout, 9*Cout)
    w2m = jnp.concatenate(rows, axis=0)                       # (4*Cout, 9*Cout)
    w2f = (w2m * jnp.tile(s2, 4)[:, None]).astype(cdt)        # BN scale folded
    t2f = jnp.tile(t2, 4)[:, None].astype(jnp.float32)
    z = matmul_bias_relu(w2f, a2.astype(cdt), t2f, out_dtype=jnp.float32)

    # (4*Cout, N*H*W) with rows = (py, px, co) -> NCHW (N, Cout, 2H, 2W)
    z = z.reshape(2, 2, Cout, N, H, W)
    z = jnp.transpose(z, (3, 2, 4, 0, 5, 1)).reshape(N, Cout, 2 * H, 2 * W)
    return z


# ----------------------------------------------------------------------------
# Pure-JAX reference (for correctness check only)
# ----------------------------------------------------------------------------
def reference_forward(x, p):
    eps = 1e-5
    dn = ("NCHW", "OIHW", "NCHW")
    y = lax.conv_general_dilated(x, p["w1"], (1, 1), ((1, 1), (1, 1)),
                                 dimension_numbers=dn,
                                 precision=lax.Precision.HIGHEST)
    y = y + p["b1"][None, :, None, None]
    y = ((y - p["m1"][None, :, None, None])
         / jnp.sqrt(p["v1"] + eps)[None, :, None, None]
         * p["g1"][None, :, None, None] + p["be1"][None, :, None, None])
    y = jnp.maximum(y, 0.0)
    wt_conv = jnp.flip(jnp.transpose(p["wt"], (1, 0, 2, 3)), axis=(2, 3))
    z = lax.conv_general_dilated(y, wt_conv, (1, 1), ((2, 2), (2, 2)),
                                 lhs_dilation=(2, 2), dimension_numbers=dn,
                                 precision=lax.Precision.HIGHEST)
    z = ((z - p["m2"][None, :, None, None])
         / jnp.sqrt(p["v2"] + eps)[None, :, None, None]
         * p["g2"][None, :, None, None] + p["be2"][None, :, None, None])
    return jnp.maximum(z, 0.0)


if __name__ == "__main__":
    key = jax.random.PRNGKey(0)
    ks = jax.random.split(key, 12)
    N, Cin, Cout, H, W = 2, 16, 32, 16, 16

    x = jax.random.normal(ks[0], (N, Cin, H, W), jnp.float32)
    p = {
        # conv3x3_block: Conv2d(Cin, Cout, 3, pad=1, bias=True) + BN + ReLU
        "w1": 0.1 * jax.random.normal(ks[1], (Cout, Cin, 3, 3), jnp.float32),
        "b1": 0.1 * jax.random.normal(ks[2], (Cout,), jnp.float32),
        "g1": 1.0 + 0.1 * jax.random.normal(ks[3], (Cout,), jnp.float32),
        "be1": 0.1 * jax.random.normal(ks[4], (Cout,), jnp.float32),
        "m1": 0.1 * jax.random.normal(ks[5], (Cout,), jnp.float32),
        "v1": jax.random.uniform(ks[6], (Cout,), jnp.float32, 0.5, 1.5),
        # DeconvBlock: ConvTranspose2d(Cout, Cout, 4, s=2, p=1, bias=False) + BN + ReLU
        "wt": 0.1 * jax.random.normal(ks[7], (Cout, Cout, 4, 4), jnp.float32),
        "g2": 1.0 + 0.1 * jax.random.normal(ks[8], (Cout,), jnp.float32),
        "be2": 0.1 * jax.random.normal(ks[9], (Cout,), jnp.float32),
        "m2": 0.1 * jax.random.normal(ks[10], (Cout,), jnp.float32),
        "v2": jax.random.uniform(ks[11], (Cout,), jnp.float32, 0.5, 1.5),
    }

    out = jax.jit(centernet_decoder_unit_forward)(x, p)
    out = jax.block_until_ready(out)
    assert out.shape == (N, Cout, 2 * H, 2 * W), out.shape

    ref = reference_forward(x, p)
    max_err = float(jnp.max(jnp.abs(out - ref)))
    # tolerance reflects bf16 rounding of the MXU operands (f32 accumulate)
    assert max_err < 1e-1, f"max abs error too large: {max_err}"
    print("KERNEL_OK")
</pallas_src>

<mosaic_0001>
module attributes {stable_mosaic.version = 11 : i64} {
  func.func @_matmul_bias_relu_kernel(%arg0: i32, %arg1: memref<32x144xbf16, #tpu.memory_space<vmem>>, %arg2: memref<144x256xbf16, #tpu.memory_space<vmem>>, %arg3: memref<32x1xf32, #tpu.memory_space<vmem>>, %arg4: memref<32x256xbf16, #tpu.memory_space<vmem>>) attributes {dimension_semantics = [#tpu.dimension_semantics<parallel>], iteration_bounds = array<i64: 2>, scalar_prefetch = 0 : i64, scratch_operands = 0 : i64, tpu.core_type = #tpu.core_type<tc>, window_params = [{pipeline_mode = #tpu.pipeline_mode<synchronous>, transform_indices = @transform_0, window_bounds = array<i64: 32, 144>}, {transform_indices = @transform_1, window_bounds = array<i64: 144, 256>}, {pipeline_mode = #tpu.pipeline_mode<synchronous>, transform_indices = @transform_2, window_bounds = array<i64: 32, 1>}, {transform_indices = @transform_3, window_bounds = array<i64: 32, 256>}]} {
    %c0 = arith.constant 0 : index
    %c0_0 = arith.constant 0 : index
    %0 = vector.load %arg1[%c0, %c0_0] : memref<32x144xbf16, #tpu.memory_space<vmem>>, vector<32x144xbf16>
    %c0_1 = arith.constant 0 : index
    %c0_2 = arith.constant 0 : index
    %1 = vector.load %arg2[%c0_1, %c0_2] : memref<144x256xbf16, #tpu.memory_space<vmem>>, vector<144x256xbf16>
    %cst = arith.constant dense<0.000000e+00> : vector<32x256xf32>
    %2 = tpu.matmul %0, %1, %cst {dimension_numbers = #tpu.dot_dimension_numbers<[1], [0], [0], [1], [0, 0, 1, 1], [], []>} : vector<32x144xbf16>, vector<144x256xbf16>, vector<32x256xf32> -> vector<32x256xf32>
    %c0_3 = arith.constant 0 : index
    %c0_4 = arith.constant 0 : index
    %3 = vector.load %arg3[%c0_3, %c0_4] : memref<32x1xf32, #tpu.memory_space<vmem>>, vector<32x1xf32>
    %4 = vector.broadcast %3 : vector<32x1xf32> to vector<32x256xf32>
    %5 = arith.addf %2, %4 : vector<32x256xf32>
    %cst_5 = arith.constant 0.000000e+00 : f32
    %6 = vector.broadcast %cst_5 : f32 to vector<32x256xf32>
    %7 = arith.maximumf %5, %6 : vector<32x256xf32>
    %8 = arith.truncf %7 : vector<32x256xf32> to vector<32x256xbf16>
    %c0_6 = arith.constant 0 : index
    %c0_7 = arith.constant 0 : index
    %9 = vector.load %arg4[%c0_6, %c0_7] : memref<32x256xbf16, #tpu.memory_space<vmem>>, vector<32x256xbf16>
    tpu.vector_store %arg4[%c0_6, %c0_7], %8 {strides = array<i32>} : memref<32x256xbf16, #tpu.memory_space<vmem>>, vector<32x256xbf16>,
    return
  }
  func.func @transform_0(%arg0: i32) -> (i32, i32) {
    %c0_i32 = arith.constant 0 : i32
    %c0_i32_0 = arith.constant 0 : i32
    %c0_i32_1 = arith.constant 0 : i32
    return %c0_i32, %c0_i32_0 : i32, i32
  }
  func.func @transform_1(%arg0: i32) -> (i32, i32) {
    %c0_i32 = arith.constant 0 : i32
    %c0_i32_0 = arith.constant 0 : i32
    return %c0_i32, %arg0 : i32, i32
  }
  func.func @transform_2(%arg0: i32) -> (i32, i32) {
    %c0_i32 = arith.constant 0 : i32
    %c0_i32_0 = arith.constant 0 : i32
    %c0_i32_1 = arith.constant 0 : i32
    return %c0_i32, %c0_i32_0 : i32, i32
  }
  func.func @transform_3(%arg0: i32) -> (i32, i32) {
    %c0_i32 = arith.constant 0 : i32
    %c0_i32_0 = arith.constant 0 : i32
    return %c0_i32, %arg0 : i32, i32
  }
}

module attributes {stable_mosaic.version = 11 : i64} {
  func.func @_matmul_bias_relu_kernel(%arg0: i32, %arg1: memref<128x288xbf16, #tpu.memory_space<vmem>>, %arg2: memref<288x256xbf16, #tpu.memory_space<vmem>>, %arg3: memref<128x1xf32, #tpu.memory_space<vmem>>, %arg4: memref<128x256xf32, #tpu.memory_space<vmem>>) attributes {dimension_semantics = [#tpu.dimension_semantics<parallel>], iteration_bounds = array<i64: 2>, scalar_prefetch = 0 : i64, scratch_operands = 0 : i64, tpu.core_type = #tpu.core_type<tc>, window_params = [{pipeline_mode = #tpu.pipeline_mode<synchronous>, transform_indices = @transform_0, window_bounds = array<i64: 128, 288>}, {transform_indices = @transform_1, window_bounds = array<i64: 288, 256>}, {pipeline_mode = #tpu.pipeline_mode<synchronous>, transform_indices = @transform_2, window_bounds = array<i64: 128, 1>}, {transform_indices = @transform_3, window_bounds = array<i64: 128, 256>}]} {
    %c0 = arith.constant 0 : index
    %c0_0 = arith.constant 0 : index
    %0 = vector.load %arg1[%c0, %c0_0] : memref<128x288xbf16, #tpu.memory_space<vmem>>, vector<128x288xbf16>
    %c0_1 = arith.constant 0 : index
    %c0_2 = arith.constant 0 : index
    %1 = vector.load %arg2[%c0_1, %c0_2] : memref<288x256xbf16, #tpu.memory_space<vmem>>, vector<288x256xbf16>
    %cst = arith.constant dense<0.000000e+00> : vector<128x256xf32>
    %2 = tpu.matmul %0, %1, %cst {dimension_numbers = #tpu.dot_dimension_numbers<[1], [0], [0], [1], [0, 0, 1, 1], [], []>} : vector<128x288xbf16>, vector<288x256xbf16>, vector<128x256xf32> -> vector<128x256xf32>
    %c0_3 = arith.constant 0 : index
    %c0_4 = arith.constant 0 : index
    %3 = vector.load %arg3[%c0_3, %c0_4] : memref<128x1xf32, #tpu.memory_space<vmem>>, vector<128x1xf32>
    %4 = vector.broadcast %3 : vector<128x1xf32> to vector<128x256xf32>
    %5 = arith.addf %2, %4 : vector<128x256xf32>
    %cst_5 = arith.constant 0.000000e+00 : f32
    %6 = vector.broadcast %cst_5 : f32 to vector<128x256xf32>
    %7 = arith.maximumf %5, %6 : vector<128x256xf32>
    %c0_6 = arith.constant 0 : index
    %c0_7 = arith.constant 0 : index
    %8 = vector.load %arg4[%c0_6, %c0_7] : memref<128x256xf32, #tpu.memory_space<vmem>>, vector<128x256xf32>
    tpu.vector_store %arg4[%c0_6, %c0_7], %7 {strides = array<i32>} : memref<128x256xf32, #tpu.memory_space<vmem>>, vector<128x256xf32>,
    return
  }
  func.func @transform_0(%arg0: i32) -> (i32, i32) {
    %c0_i32 = arith.constant 0 : i32
    %c0_i32_0 = arith.constant 0 : i32
    %c0_i32_1 = arith.constant 0 : i32
    return %c0_i32, %c0_i32_0 : i32, i32
  }
  func.func @transform_1(%arg0: i32) -> (i32, i32) {
    %c0_i32 = arith.constant 0 : i32
    %c0_i32_0 = arith.constant 0 : i32
    return %c0_i32, %arg0 : i32, i32
  }
  func.func @transform_2(%arg0: i32) -> (i32, i32) {
    %c0_i32 = arith.constant 0 : i32
    %c0_i32_0 = arith.constant 0 : i32
    %c0_i32_1 = arith.constant 0 : i32
    return %c0_i32, %c0_i32_0 : i32, i32
  }
  func.func @transform_3(%arg0: i32) -> (i32, i32) {
    %c0_i32 = arith.constant 0 : i32
    %c0_i32_0 = arith.constant 0 : i32
    return %c0_i32, %arg0 : i32, i32
  }
}

</mosaic_0001>

<bundles_post_ra>
// kernel: centernet_decoder_unit_forward.2
= control target key start
LH: loop header
LB: loop body
LE: loop exit
PB: predicated region body
PF: predicated region fallthrough
CT: control target
= control target key end

     0   :  { %s805_s12 = smov 0   ;;  %s807_s13 = smov 0   ;;  %s933_s0 = inlined_call_operand.vmem [shape: bf16[32,144], index: 0, kind: input, shape index: {}]   ;;  %s934_s1 = inlined_call_operand.vmem [shape: bf16[144,512], index: 1, kind: input, shape index: {}]   ;;  %s935_s2 = inlined_call_operand.vmem [shape: f32[32,1], index: 2, kind: input, shape index: {}]   ;;  %s936_s3 = inlined_call_operand.vmem [shape: bf16[32,512], index: 3, kind: output, shape index: {}]  }
   0x1   :  { %s809_s14 = smov 0  }
   0x2 LB: > { %s633_s15 = sadd.s32 4294967295, %s782_s14   ;;  %s822_s16 = sadd.s32 1, %s782_s14   ;;  %s782_s14 = sphi %s809_s14, %s940_s14   ;;  %s778_s13 = sphi %s807_s13, %s939_s13   ;;  %s774_s12 = sphi %s805_s12, %s938_s12  }
   0x3   : > { %s38_s17 = ssub.s32 %s782_s14, %s822_s16  ;;  %s41_s18 = sadd.s32 1, %s778_s13 }
   0x4   : > { %p39_p0 = scmp.eq.s32.totalorder %s38_s17, 0  ;;  %p48_p1 = scmp.ne.s32.totalorder %s778_s13, %s774_s12 }
   0x5   : > { %p49_p2 = scmp.eq.s32.totalorder %s782_s14, 0  ;;  %p99_p3 = scmp.eq.s32.totalorder %s633_s15, 1 }
   0x6   : > { %s833_s19 = scalar_select %p39_p0, %s778_s13, %s41_s18  }
   0x7   : > { %p50_p4 = por %p49_p2, %p48_p1  ;;  %p835_p5 = por %p99_p3, %p48_p1 }
   0x8   : > { %p636_p6 = scmp.ge.s32.totalorder %s782_s14, 2 }
   0xa   : > { %127 = sbr.rel (%p636_p6) target bundleno = 28 (0x1c), region = 24 }
   0xf   : > { %130 = sbr.rel (!%p50_p4) target bundleno = 28 (0x1c), region = 28  ;;  %s132_s21 = sand.u32 (%p50_p4), 1, %s778_s13  }
  0x10   : > { %s674_s22 = sshll.u32 (%p50_p4), %s782_s14, 3  ;;  %s698_s23 = smul.u32 (%p50_p4), 144, %s132_s21 }
  0x11   : > { %s845_s26 = scalar_lea.vmem (%p50_p4), %s934_s1, %s674_s22 }
  0x12   : > { %v200_v0 = vld [vmem:[%s845_s26] sm:$0xff] (%p50_p4)  ;;  %v202_v1 = vld [vmem:[%s845_s26 + $0x10] sm:$0xff] (%p50_p4)  ;;  %s134_s27 = scalar_lea.vmem (%p50_p4), [#allocation2], %s698_s23 }
  0x13   : > { %v204_v2 = vld [vmem:[%s845_s26 + $0x20] sm:$0xff] (%p50_p4)  ;;  %v206_v3 = vld [vmem:[%s845_s26 + $0x30] sm:$0xff] (%p50_p4)  ;;  %201 = vst [vmem:[%s134_s27] sm:$0xff] (%p50_p4), %v200_v0  ;;  %203 = vst [vmem:[%s134_s27 + $0x8] sm:$0xff] (%p50_p4), %v202_v1 }
  0x14   : > { %v208_v4 = vld [vmem:[%s845_s26 + $0x40] sm:$0xff]  ;;  %v210_v5 = vld [vmem:[%s845_s26 + $0x50] sm:$0xff]  ;;  %205 = vst [vmem:[%s134_s27 + $0x10] sm:$0xff] %v204_v2  ;;  %207 = vst [vmem:[%s134_s27 + $0x18] sm:$0xff] %v206_v3 }
  0x15   : > { %209 = vst [vmem:[%s134_s27 + $0x20] sm:$0xff] %v208_v4  ;;  %211 = vst [vmem:[%s134_s27 + $0x28] sm:$0xff] %v210_v5  ;;  %v212_v6 = vld [vmem:[%s845_s26 + $0x60] sm:$0xff]  ;;  %v214_v7 = vld [vmem:[%s845_s26 + $0x70] sm:$0xff] }
  0x16   : > { %v216_v8 = vld [vmem:[%s845_s26 + $0x80] sm:$0xff]  ;;  %213 = vst [vmem:[%s134_s27 + $0x30] sm:$0xff] %v212_v6  ;;  %215 = vst [vmem:[%s134_s27 + $0x38] sm:$0xff] %v214_v7  ;;  %v218_v9 = vld [vmem:[%s845_s26 + $0x90] sm:$0xff] }
  0x17   : > { %217 = vst [vmem:[%s134_s27 + $0x40] sm:$0xff] %v216_v8  ;;  %v220_v10 = vld [vmem:[%s845_s26 + $0xa0] sm:$0xff]  ;;  %v222_v11 = vld [vmem:[%s845_s26 + $0xb0] sm:$0xff]  ;;  %219 = vst [vmem:[%s134_s27 + $0x48] sm:$0xff] %v218_v9 }
  0x18   : > { %221 = vst [vmem:[%s134_s27 + $0x50] sm:$0xff] %v220_v10  ;;  %223 = vst [vmem:[%s134_s27 + $0x58] sm:$0xff] %v222_v11  ;;  %v224_v12 = vld [vmem:[%s845_s26 + $0xc0] sm:$0xff]  ;;  %v226_v13 = vld [vmem:[%s845_s26 + $0xd0] sm:$0xff] }
  0x19   : > { %v228_v14 = vld [vmem:[%s845_s26 + $0xe0] sm:$0xff]  ;;  %225 = vst [vmem:[%s134_s27 + $0x60] sm:$0xff] %v224_v12  ;;  %227 = vst [vmem:[%s134_s27 + $0x68] sm:$0xff] %v226_v13  ;;  %v230_v15 = vld [vmem:[%s845_s26 + $0xf0] sm:$0xff] }
  0x1a   : > { %229 = vst [vmem:[%s134_s27 + $0x70] sm:$0xff] %v228_v14  ;;  %v232_v16 = vld [vmem:[%s845_s26 + $0x100] sm:$0xff]  ;;  %v234_v17 = vld [vmem:[%s845_s26 + $0x110] sm:$0xff]  ;;  %231 = vst [vmem:[%s134_s27 + $0x78] sm:$0xff] %v230_v15 }
  0x1b   : > { %233 = vst [vmem:[%s134_s27 + $0x80] sm:$0xff] %v232_v16  ;;  %235 = vst [vmem:[%s134_s27 + $0x88] sm:$0xff] %v234_v17 }
  0x1c PF: > { %p639_p7 = scmp.ge.s32.totalorder %s782_s14, 1  ;;  %p240_p8 = scmp.lt.s32.totalorder %s782_s14, 3 }
  0x1e   : > { %p241_p9 = pnand %p639_p7, %p240_p8 }
  0x1f   : > { %s247_s28 = sand.u32 (!%p241_p9), 1, %s774_s12  }
  0x20   : > { %244 = sbr.rel (%p241_p9) target bundleno = 291 (0x123), region = 66  ;;  %s640_s27 = sshll.u32 (!%p241_p9), %s247_s28, 5 }
  0x21   : > { %s699_s29 = smul.u32 (!%p241_p9), 144, %s247_s28  ;;  %s268_s12 = scalar_lea.vmem (!%p241_p9), [#allocation3], %s640_s27 }
  0x23   : > { %s882_s11 = scalar_lea.vmem (!%p241_p9), [#allocation2], %s699_s29 }
  0x25   : > { %vm426_vm0 = vcmask 130048   ;;  %v756_v18 = vld [vmem:[%s933_s0 + $0x4] ss:$8 sps:$4 sm:$0xff]   ;;  %v759_v19 = vld [vmem:[%s933_s0 + $0x14] ss:$8 sps:$4 sm:$0xff]   ;;  %v784_v20 = vmov 0  }
  0x26   : > { %726 = vset.pattern.permute.xlu1 %v784_v20  ;;  %725 = vset.pattern.permute.xlu0 %v784_v20  ;;  %v296_v21 = vld [vmem:[%s935_s2 + $0x10] sm:$0xff]  ;;  %v294_v22 = vld [vmem:[%s935_s2] sm:$0xff]  ;;  %v297_v24 = vld [vmem:[%s935_s2 + $0x18] sm:$0xff]  ;;  %s679_s28 = sshll.u32 (%p835_p5), %s633_s15, 3 }
  0x27   : > { %663 = vmatprep.mubr.msk.bf16.mxu0 %vm426_vm0, %v756_v18  ;;  %310 = vperm.xlu1 %726, %v296_v21   ;;  %v727_v23 = vld [vmem:[%s882_s11 + $0x74] ss:$8 sps:$4 sm:$0xff]   ;;  %v729_v25 = vld [vmem:[%s882_s11 + $0x70] ss:$8 sps:$4 sm:$0xff]   ;;  %v730_v26 = vld [vmem:[%s882_s11 + $0x64] ss:$8 sps:$4 sm:$0xff]   ;;  %s531_s4 = scalar_lea.vmem (%p835_p5), %s936_s3, %s679_s28 }
  0x28   : > { %664 = vmatprep.mubr.msk.bf16.mxu1 %vm426_vm0, %v759_v19  ;;  %300 = vperm.xlu0 %725, %v294_v22   ;;  %v295_v27 = vld [vmem:[%s935_s2 + $0x8] sm:$0xff]  ;;  %v757_v44 = vld [vmem:[%s933_s0 + $0x10] ss:$8 sps:$4 sm:$0xff]  }
  0x29   : > { %433 = vmatprep.subr.bf16.mxu0 %v727_v23  ;;  %680 = vmatprep.subr.bf16.mxu1 %v727_v23  ;;  %v732_v28 = vld [vmem:[%s882_s11 + $0x60] ss:$8 sps:$4 sm:$0xff]   ;;  %v733_v29 = vld [vmem:[%s882_s11 + $0x54] ss:$8 sps:$4 sm:$0xff]   ;;  %v735_v30 = vld [vmem:[%s882_s11 + $0x50] ss:$8 sps:$4 sm:$0xff]  }
  0x2a   : > { %434 = vmatpush1.bf16.msra.mxu0 %v729_v25  ;;  %689 = vmatpush1.bf16.msra.mxu1 %v729_v25  ;;  %v736_v31 = vld [vmem:[%s882_s11 + $0x44] ss:$8 sps:$4 sm:$0xff]   ;;  %v738_v32 = vld [vmem:[%s882_s11 + $0x40] ss:$8 sps:$4 sm:$0xff]   ;;  %v739_v33 = vld [vmem:[%s882_s11 + $0x34] ss:$8 sps:$4 sm:$0xff]  }
  0x2b   : > { %435 = vmatprep.subr.bf16.mxu0 %v730_v26  ;;  %681 = vmatprep.subr.bf16.mxu1 %v730_v26  ;;  %v741_v34 = vld [vmem:[%s882_s11 + $0x30] ss:$8 sps:$4 sm:$0xff]   ;;  %v742_v35 = vld [vmem:[%s882_s11 + $0x24] ss:$8 sps:$4 sm:$0xff]   ;;  %v744_v36 = vld [vmem:[%s882_s11 + $0x20] ss:$8 sps:$4 sm:$0xff]  }
  0x2c   : > { %315 = vperm.xlu1 %726, %v297_v24   ;;  %305 = vperm.xlu0 %725, %v295_v27   ;;  %v745_v37 = vld [vmem:[%s882_s11 + $0x14] ss:$8 sps:$4 sm:$0xff]   ;;  %v747_v38 = vld [vmem:[%s882_s11 + $0x10] ss:$8 sps:$4 sm:$0xff]   ;;  %v748_v39 = vld [vmem:[%s882_s11 + $0x4] ss:$8 sps:$4 sm:$0xff]  }
  0x2d   : > { %v750_v40 = vld [vmem:[%s882_s11] ss:$8 sps:$4 sm:$0xff]   ;;  %v751_v41 = vld [vmem:[%s882_s11 + $0x84] ss:$8 sps:$4 sm:$0xff]  }
  0x2e   : > { %436 = vmatpush1.bf16.msra.mxu0 %v732_v28  ;;  %690 = vmatpush1.bf16.msra.mxu1 %v732_v28  ;;  %v753_v42 = vld [vmem:[%s882_s11 + $0x80] ss:$8 sps:$4 sm:$0xff]  }
  0x2f   : > { %437 = vmatprep.subr.bf16.mxu0 %v733_v29  ;;  %682 = vmatprep.subr.bf16.mxu1 %v733_v29  ;;  %v754_v43 = vld [vmem:[%s933_s0] ss:$8 sps:$4 sm:$0xff]  }
  0x32   : > { %438 = vmatpush1.bf16.msra.mxu0 %v735_v30  ;;  %691 = vmatpush1.bf16.msra.mxu1 %v735_v30 }
  0x33   : > { %439 = vmatprep.subr.bf16.mxu0 %v736_v31  ;;  %683 = vmatprep.subr.bf16.mxu1 %v736_v31 }
  0x36   : > { %440 = vmatpush1.bf16.msra.mxu0 %v738_v32  ;;  %692 = vmatpush1.bf16.msra.mxu1 %v738_v32 }
  0x37   : > { %441 = vmatprep.subr.bf16.mxu0 %v739_v33  ;;  %684 = vmatprep.subr.bf16.mxu1 %v739_v33 }
  0x3a   : > { %442 = vmatpush1.bf16.msra.mxu0 %v741_v34  ;;  %693 = vmatpush1.bf16.msra.mxu1 %v741_v34 }
  0x3b   : > { %443 = vmatprep.subr.bf16.mxu0 %v742_v35  ;;  %685 = vmatprep.subr.bf16.mxu1 %v742_v35 }
  0x3e   : > { %444 = vmatpush1.bf16.msra.mxu0 %v744_v36  ;;  %694 = vmatpush1.bf16.msra.mxu1 %v744_v36 }
  0x3f   : > { %445 = vmatprep.subr.bf16.mxu0 %v745_v37  ;;  %686 = vmatprep.subr.bf16.mxu1 %v745_v37 }
  0x42   : > { %446 = vmatpush1.bf16.msra.mxu0 %v747_v38  ;;  %695 = vmatpush1.bf16.msra.mxu1 %v747_v38 }
  0x43   : > { %447 = vmatprep.subr.bf16.mxu0 %v748_v39  ;;  %687 = vmatprep.subr.bf16.mxu1 %v748_v39 }
  0x46   : > { %448 = vmatpush1.bf16.msra.mxu0 %v750_v40  ;;  %696 = vmatpush1.bf16.msra.mxu1 %v750_v40 }
  0x47   : > { %463 = vmatprep.subr.bf16.mxu0 %v751_v41  ;;  %688 = vmatprep.subr.bf16.mxu1 %v751_v41 }
  0x4a   : > { %464 = vmatpush2.bf16.msra.mxu0 %v753_v42  ;;  %697 = vmatpush2.bf16.msra.mxu1 %v753_v42 }
  0x4d   : > { %466 = vmatmul.mubr.bf16.vlgmr.msra.gmra.mxu0 %v754_v43  ;;  %476 = vmatmul.mubr.bf16.vlgmr.msra.gmra.mxu1 %v757_v44 }
  0xa2   : > { %v311_v45 = vpop.permute.xlu1 %310 }
  0xa3   : > { %v301_v46 = vpop.permute.xlu0 %300 }
  0xa7   : > { %v316_v59 = vpop.permute.xlu1 %315  ;;  %v306_v60 = vpop.permute.xlu0 %305 }
 0x10d   : > { %v467_v47 = vpop.f32.mrf.mxu0  ;;  %v477_v48 = vpop.f32.mrf.mxu1 }
 0x10e   : > { %v468_v49 = vadd.f32 %v467_v47, %v301_v46  ;;  %v478_v50 = vadd.f32 %v477_v48, %v311_v45 }
 0x10f   : > { %v469_v51 = vpop.f32.mrf.mxu0  ;;  %v479_v52 = vpop.f32.mrf.mxu1 }
 0x110   : > { %v470_v53 = vadd.f32 %v469_v51, %v301_v46  ;;  %v480_v54 = vadd.f32 %v479_v52, %v311_v45  ;;  %v486_v57 = vmax.f32 %v468_v49, 0.0  ;;  %v490_v58 = vmax.f32 %v478_v50, 0.0 }
 0x111   : > { %v471_v55 = vpop.f32.mrf.mxu0  ;;  %v481_v56 = vpop.f32.mrf.mxu1 }
 0x112   : > { %v487_v61 = vmax.f32 %v470_v53, 0.0  ;;  %v491_v62 = vmax.f32 %v480_v54, 0.0  ;;  %v472_v63 = vadd.f32 %v471_v55, %v306_v60  ;;  %v482_v0 = vadd.f32 %v481_v56, %v316_v59 }
 0x113   : > { %v473_v1 = vpop.f32.mrf.mxu0  ;;  %v483_v2 = vpop.f32.mrf.mxu1 }
 0x114   : > { %v675_v3 = vpack.c.bf16 %v487_v61, %v486_v57  ;;  %v677_v4 = vpack.c.bf16 %v491_v62, %v490_v58  ;;  %v474_v5 = vadd.f32 %v473_v1, %v306_v60  ;;  %v484_v6 = vadd.f32 %v483_v2, %v316_v59 }
 0x115   : > { %v488_v7 = vmax.f32 %v472_v63, 0.0  ;;  %v492_v8 = vmax.f32 %v482_v0, 0.0 }
 0x116   : > { %518 = vst [vmem:[%s268_s12] sm:$0xff] %v675_v3  ;;  %520 = vst [vmem:[%s268_s12 + $0x10] sm:$0xff] %v677_v4  ;;  %v489_v9 = vmax.f32 %v474_v5, 0.0  ;;  %v493_v10 = vmax.f32 %v484_v6, 0.0  ;;  %528 = sbr.rel (!%p835_p5) target bundleno = 291 (0x123), region = 74 }
 0x118   : > { %v676_v11 = vpack.c.bf16 %v489_v9, %v488_v7  ;;  %v678_v12 = vpack.c.bf16 %v493_v10, %v492_v8 }
 0x11a   : > { %519 = vst [vmem:[%s268_s12 + $0x8] sm:$0xff] %v676_v11  ;;  %521 = vst [vmem:[%s268_s12 + $0x18] sm:$0xff] %v678_v12 }
 0x11d   : > { %v566_v13 = vld [vmem:[%s268_s12] sm:$0xff]  ;;  %v570_v15 = vld [vmem:[%s268_s12 + $0x10] sm:$0xff] }
 0x11e   : > { %567 = vst [vmem:[%s531_s4] sm:$0xff] %v566_v13  ;;  %571 = vst [vmem:[%s531_s4 + $0x20] sm:$0xff] %v570_v15 }
 0x121   : > { %v568_v14 = vld [vmem:[%s268_s12 + $0x8] sm:$0xff]  ;;  %v572_v16 = vld [vmem:[%s268_s12 + $0x18] sm:$0xff] }
 0x122   : > { %569 = vst [vmem:[%s531_s4 + $0x10] sm:$0xff] %v568_v14  ;;  %573 = vst [vmem:[%s531_s4 + $0x30] sm:$0xff] %v572_v16 }
 0x123 PF: > { %p10_p10 = scmp.ge.s32.totalorder %s822_s16, 4   ;;  %s938_s12 = smov %s778_s13 }
 0x124   : > { %s939_s13 = smov %s833_s19  ;;  %s940_s14 = smov %s822_s16 }
 0x125   :  { %12 = sbr.rel (!%p10_p10) target bundleno = 2 (0x2), region = 143 }

// kernel: tile.13
= control target key start
LH: loop header
LB: loop body
LE: loop exit
PB: predicated region body
PF: predicated region fallthrough
CT: control target
= control target key end

     0   :  { %s22_s0 = inlined_call_operand.vmem [shape: f32[32], index: 0, kind: input, shape index: {}]   ;;  %s23_s1 = inlined_call_operand.vmem [shape: f32[4,32], index: 1, kind: output, shape index: {}]  }
   0x1   :  { %v4_v0 = vld [vmem:[%s22_s0] ss:$0 sm:$0xff] }
   0x2   :  { %5 = vst [vmem:[%s23_s1] sm:$0xf] %v4_v0 }

// kernel: mul.17
= control target key start
LH: loop header
LB: loop body
LE: loop exit
PB: predicated region body
PF: predicated region fallthrough
CT: control target
= control target key end

     0   :  { %vm8_vm0 = vcmask 261120   ;;  %s40_s8 = smov 32   ;;  %s41_s9 = smov 64   ;;  %vm14_vm1 = vcmask 1048320   ;;  %vm20_vm2 = vcmask 785920   ;;  %vm26_vm3 = vcmask 523520   ;;  %s58_s0 = inlined_call_operand.vmem [shape: f32[4,32], index: 0, kind: input, shape index: {}]   ;;  %s59_s1 = inlined_call_operand.vmem [shape: f32[128], index: 1, kind: output, shape index: {}]  }
   0x1   :  { %v5_v0 = vld [vmem:[%s58_s0] sm:$0xf]  ;;  %s39_s0 = smov 96  }
   0x2   :  { %6 = vst [vmem:[#allocation1] sm:$0xf] %v5_v0 }
   0x9   :  { %v11_v1 = vld [vmem:[#allocation1 + $0x3] sm:$0x1]   ;;  %v23_v2 = vld [vmem:[#allocation1 + $0x1] sm:$0x1]   ;;  %v7_v3 = vld [vmem:[#allocation1] sm:$0x1]  }
   0xa   :  { %12 = vrot.lane.b32.xlu0 %v11_v1, %s39_s0  ;;  %24 = vrot.lane.b32.xlu1 %v23_v2, %s40_s8  ;;  %v17_v4 = vld [vmem:[#allocation1 + $0x2] sm:$0x1]   ;;  %9 = vst.msk [vmem:[#allocation0] sm:$0x1] %vm8_vm0, %v7_v3  }
   0xe   :  { %18 = vrot.lane.b32.xlu0 %v17_v4, %s41_s9 }
  0x7c   :  { %v13_v5 = vpop.permute.xlu0 %12   ;;  %v25_v6 = vpop.permute.xlu1 %24  }
  0x7d   :  { %15 = vst.msk [vmem:[#allocation0] sm:$0x1] %vm14_vm1, %v13_v5  }
  0x80   :  { %v19_v7 = vpop.permute.xlu0 %18  }
  0x81   :  { %21 = vst.msk [vmem:[#allocation0] sm:$0x1] %vm20_vm2, %v19_v7  }
  0x82   :  { %27 = vst.msk [vmem:[#allocation0] sm:$0x1] %vm26_vm3, %v25_v6  }
  0x89   :  { %v32_v8 = vld [vmem:[#allocation0] sm:$0x1] }
  0x8a   :  { %35 = vst [vmem:[%s59_s1] sm:$0x1] %v32_v8 }

// kernel: tile.0
= control target key start
LH: loop header
LB: loop body
LE: loop exit
PB: predicated region body
PF: predicated region fallthrough
CT: control target
= control target key end

     0   :  { %s547_s8 = smov 125   ;;  %s548_s9 = smov 126   ;;  %vm8_vm0 = vcmask 7168   ;;  %s1102_s0 = inlined_call_operand.vmem [shape: f32[4,32], index: 0, kind: input, shape index: {}]   ;;  %s1103_s1 = inlined_call_operand.vmem [shape: f32[128,1], index: 1, kind: output, shape index: {}]  }
   0x1   :  { %v5_v0 = vld [vmem:[%s1102_s0] sm:$0xf]  ;;  %s546_s0 = smov 127   ;;  %s549_s10 = smov 124  }
   0x2   :  { %6 = vst [vmem:[#allocation0] sm:$0xf] %v5_v0  ;;  %s550_s11 = smov 123   ;;  %s551_s12 = smov 122  }
   0x3   :  { %s552_s13 = smov 121   ;;  %s553_s14 = smov 120  }
   0x4   :  { %s554_s15 = smov 119   ;;  %s555_s16 = smov 118  }
   0x5   :  { %s556_s17 = smov 117   ;;  %s557_s18 = smov 116  }
   0x6   :  { %s558_s19 = smov 115   ;;  %s559_s20 = smov 114  }
   0x7   :  { %s560_s21 = smov 113   ;;  %s561_s22 = smov 112  }
   0x8   :  { %s562_s23 = smov 111   ;;  %s563_s24 = smov 110  }
   0x9   :  { %v16_v1 = vld [vmem:[#allocation0] sm:$0xf]   ;;  %s564_s25 = smov 109   ;;  %s565_s26 = smov 108  }
   0xa   :  { %v40_v2 = vld [vmem:[#allocation0] sm:$0xf]   ;;  %17 = vrot.lane.b32.xlu0 %v16_v1, %s546_s0  ;;  %s566_s27 = smov 107   ;;  %s567_s28 = smov 106  }
   0xb   :  { %41 = vrot.lane.b32.xlu1 %v40_v2, %s547_s8  ;;  %v28_v3 = vld [vmem:[#allocation0] sm:$0xf]   ;;  %s568_s29 = smov 105   ;;  %s569_s30 = smov 104  }
   0xc   :  { %v52_v4 = vld [vmem:[#allocation0] sm:$0xf]  }
   0xd   :  { %v64_v5 = vld [vmem:[#allocation0] sm:$0xf]  }
   0xe   :  { %29 = vrot.lane.b32.xlu0 %v28_v3, %s548_s9  ;;  %v76_v6 = vld [vmem:[#allocation0] sm:$0xf]   ;;  %s570_s9 = smov 103  }
   0xf   :  { %53 = vrot.lane.b32.xlu1 %v52_v4, %s549_s10  ;;  %v88_v7 = vld [vmem:[#allocation0] sm:$0xf]   ;;  %s571_s10 = smov 102  }
  0x10   :  { %v100_v8 = vld [vmem:[#allocation0] sm:$0xf]  }
  0x11   :  { %v112_v9 = vld [vmem:[#allocation0] sm:$0xf]  }
  0x12   :  { %65 = vrot.lane.b32.xlu0 %v64_v5, %s550_s11  ;;  %v124_v10 = vld [vmem:[#allocation0] sm:$0xf]   ;;  %s572_s11 = smov 101  }
  0x13   :  { %77 = vrot.lane.b32.xlu1 %v76_v6, %s551_s12  ;;  %v136_v11 = vld [vmem:[#allocation0] sm:$0xf]   ;;  %s573_s12 = smov 100  }
  0x14   :  { %v148_v12 = vld [vmem:[#allocation0] sm:$0xf]  }
  0x15   :  { %v160_v13 = vld [vmem:[#allocation0] sm:$0xf]  }
  0x16   :  { %89 = vrot.lane.b32.xlu0 %v88_v7, %s552_s13  ;;  %v172_v14 = vld [vmem:[#allocation0] sm:$0xf]   ;;  %s574_s13 = smov 99  }
  0x17   :  { %101 = vrot.lane.b32.xlu1 %v100_v8, %s553_s14  ;;  %v184_v15 = vld [vmem:[#allocation0] sm:$0xf]   ;;  %s575_s14 = smov 98  }
  0x18   :  { %v196_v16 = vld [vmem:[#allocation0] sm:$0xf]  }
  0x19   :  { %v208_v17 = vld [vmem:[#allocation0] sm:$0xf]  }
  0x1a   :  { %113 = vrot.lane.b32.xlu0 %v112_v9, %s554_s15  ;;  %v220_v18 = vld [vmem:[#allocation0] sm:$0xf]   ;;  %s576_s15 = smov 97  }
  0x1b   :  { %125 = vrot.lane.b32.xlu1 %v124_v10, %s555_s16  ;;  %v232_v19 = vld [vmem:[#allocation0] sm:$0xf]  }
  0x1c   :  { %v244_v20 = vld [vmem:[#allocation0] sm:$0xf]  }
  0x1d   :  { %v256_v21 = vld [vmem:[#allocation0] sm:$0xf]  }
  0x1e   :  { %137 = vrot.lane.b32.xlu0 %v136_v11, %s556_s17  ;;  %v268_v22 = vld [vmem:[#allocation0] sm:$0xf]  }
  0x1f   :  { %149 = vrot.lane.b32.xlu1 %v148_v12, %s557_s18  ;;  %v280_v23 = vld [vmem:[#allocation0] sm:$0xf]  }
  0x20   :  { %v292_v24 = vld [vmem:[#allocation0] sm:$0xf]  }
  0x21   :  { %v304_v25 = vld [vmem:[#allocation0] sm:$0xf]  }
  0x22   :  { %161 = vrot.lane.b32.xlu0 %v160_v13, %s558_s19  ;;  %v316_v26 = vld [vmem:[#allocation0] sm:$0xf]  }
  0x23   :  { %173 = vrot.lane.b32.xlu1 %v172_v14, %s559_s20  ;;  %v7_v27 = vld [vmem:[#allocation0] sm:$0xf]  }
  0x24   :  { %9 = vst.msk [vmem:[%s1103_s1] sm:$0x1] %vm8_vm0, %v7_v27   ;;  %388 = vst.msk [vmem:[%s1103_s1 + $0x1f] sm:$0x2] %vm8_vm0, %v7_v27   ;;  %v328_v28 = vld [vmem:[#allocation0] sm:$0xf]  }
  0x25   :  { %389 = vst.msk [vmem:[%s1103_s1 + $0x3e] sm:$0x4] %vm8_vm0, %v7_v27   ;;  %390 = vst.msk [vmem:[%s1103_s1 + $0x5d] sm:$0x8] %vm8_vm0, %v7_v27   ;;  %v340_v29 = vld [vmem:[#allocation0] sm:$0xf]  }
  0x26   :  { %185 = vrot.lane.b32.xlu0 %v184_v15, %s560_s21  ;;  %v352_v30 = vld [vmem:[#allocation0] sm:$0xf]  }
  0x27   :  { %197 = vrot.lane.b32.xlu1 %v196_v16, %s561_s22  ;;  %v364_v31 = vld [vmem:[#allocation0] sm:$0xf]  }
  0x28   :  { %v376_v32 = vld [vmem:[#allocation0] sm:$0xf]  }
  0x2a   :  { %209 = vrot.lane.b32.xlu0 %v208_v17, %s562_s23 }
  0x2b   :  { %221 = vrot.lane.b32.xlu1 %v220_v18, %s563_s24 }
  0x2e   :  { %233 = vrot.lane.b32.xlu0 %v232_v19, %s564_s25 }
  0x2f   :  { %245 = vrot.lane.b32.xlu1 %v244_v20, %s565_s26 }
  0x32   :  { %257 = vrot.lane.b32.xlu0 %v256_v21, %s566_s27 }
  0x33   :  { %269 = vrot.lane.b32.xlu1 %v268_v22, %s567_s28 }
  0x36   :  { %281 = vrot.lane.b32.xlu0 %v280_v23, %s568_s29 }
  0x37   :  { %293 = vrot.lane.b32.xlu1 %v292_v24, %s569_s30 }
  0x3a   :  { %305 = vrot.lane.b32.xlu0 %v304_v25, %s570_s9 }
  0x3b   :  { %317 = vrot.lane.b32.xlu1 %v316_v26, %s571_s10 }
  0x3e   :  { %329 = vrot.lane.b32.xlu0 %v328_v28, %s572_s11 }
  0x3f   :  { %341 = vrot.lane.b32.xlu1 %v340_v29, %s573_s12 }
  0x42   :  { %353 = vrot.lane.b32.xlu0 %v352_v30, %s574_s13 }
  0x43   :  { %365 = vrot.lane.b32.xlu1 %v364_v31, %s575_s14 }
  0x46   :  { %377 = vrot.lane.b32.xlu0 %v376_v32, %s576_s15 }
  0x7c   :  { %v18_v33 = vpop.permute.xlu0 %17  }
  0x7d   :  { %v42_v34 = vpop.permute.xlu1 %41   ;;  %391 = vst.msk [vmem:[%s1103_s1 + $0x1] sm:$0x1] %vm8_vm0, %v18_v33   ;;  %392 = vst.msk [vmem:[%s1103_s1 + $0x20] sm:$0x2] %vm8_vm0, %v18_v33  }
  0x7e   :  { %393 = vst.msk [vmem:[%s1103_s1 + $0x3f] sm:$0x4] %vm8_vm0, %v18_v33   ;;  %394 = vst.msk [vmem:[%s1103_s1 + $0x5e] sm:$0x8] %vm8_vm0, %v18_v33  }
  0x7f   :  { %399 = vst.msk [vmem:[%s1103_s1 + $0x3] sm:$0x1] %vm8_vm0, %v42_v34   ;;  %400 = vst.msk [vmem:[%s1103_s1 + $0x22] sm:$0x2] %vm8_vm0, %v42_v34  }
  0x80   :  { %401 = vst.msk [vmem:[%s1103_s1 + $0x41] sm:$0x4] %vm8_vm0, %v42_v34   ;;  %402 = vst.msk [vmem:[%s1103_s1 + $0x60] sm:$0x8] %vm8_vm0, %v42_v34   ;;  %v30_v35 = vpop.permute.xlu0 %29  }
  0x81   :  { %v54_v36 = vpop.permute.xlu1 %53   ;;  %395 = vst.msk [vmem:[%s1103_s1 + $0x2] sm:$0x1] %vm8_vm0, %v30_v35   ;;  %396 = vst.msk [vmem:[%s1103_s1 + $0x21] sm:$0x2] %vm8_vm0, %v30_v35  }
  0x82   :  { %397 = vst.msk [vmem:[%s1103_s1 + $0x40] sm:$0x4] %vm8_vm0, %v30_v35   ;;  %398 = vst.msk [vmem:[%s1103_s1 + $0x5f] sm:$0x8] %vm8_vm0, %v30_v35  }
  0x83   :  { %403 = vst.msk [vmem:[%s1103_s1 + $0x4] sm:$0x1] %vm8_vm0, %v54_v36   ;;  %404 = vst.msk [vmem:[%s1103_s1 + $0x23] sm:$0x2] %vm8_vm0, %v54_v36  }
  0x84   :  { %405 = vst.msk [vmem:[%s1103_s1 + $0x42] sm:$0x4] %vm8_vm0, %v54_v36   ;;  %406 = vst.msk [vmem:[%s1103_s1 + $0x61] sm:$0x8] %vm8_vm0, %v54_v36   ;;  %v66_v37 = vpop.permute.xlu0 %65  }
  0x85   :  { %v78_v38 = vpop.permute.xlu1 %77   ;;  %407 = vst.msk [vmem:[%s1103_s1 + $0x5] sm:$0x1] %vm8_vm0, %v66_v37   ;;  %408 = vst.msk [vmem:[%s1103_s1 + $0x24] sm:$0x2] %vm8_vm0, %v66_v37  }
  0x86   :  { %409 = vst.msk [vmem:[%s1103_s1 + $0x43] sm:$0x4] %vm8_vm0, %v66_v37   ;;  %410 = vst.msk [vmem:[%s1103_s1 + $0x62] sm:$0x8] %vm8_vm0, %v66_v37  }
  0x87   :  { %411 = vst.msk [vmem:[%s1103_s1 + $0x6] sm:$0x1] %vm8_vm0, %v78_v38   ;;  %412 = vst.msk [vmem:[%s1103_s1 + $0x25] sm:$0x2] %vm8_vm0, %v78_v38  }
  0x88   :  { %413 = vst.msk [vmem:[%s1103_s1 + $0x44] sm:$0x4] %vm8_vm0, %v78_v38   ;;  %414 = vst.msk [vmem:[%s1103_s1 + $0x63] sm:$0x8] %vm8_vm0, %v78_v38   ;;  %v90_v39 = vpop.permute.xlu0 %89  }
  0x89   :  { %v102_v40 = vpop.permute.xlu1 %101   ;;  %415 = vst.msk [vmem:[%s1103_s1 + $0x7] sm:$0x1] %vm8_vm0, %v90_v39   ;;  %416 = vst.msk [vmem:[%s1103_s1 + $0x26] sm:$0x2] %vm8_vm0, %v90_v39  }
  0x8a   :  { %417 = vst.msk [vmem:[%s1103_s1 + $0x45] sm:$0x4] %vm8_vm0, %v90_v39   ;;  %418 = vst.msk [vmem:[%s1103_s1 + $0x64] sm:$0x8] %vm8_vm0, %v90_v39  }
  0x8b   :  { %419 = vst.msk [vmem:[%s1103_s1 + $0x8] sm:$0x1] %vm8_vm0, %v102_v40   ;;  %420 = vst.msk [vmem:[%s1103_s1 + $0x27] sm:$0x2] %vm8_vm0, %v102_v40  }
  0x8c   :  { %421 = vst.msk [vmem:[%s1103_s1 + $0x46] sm:$0x4] %vm8_vm0, %v102_v40   ;;  %422 = vst.msk [vmem:[%s1103_s1 + $0x65] sm:$0x8] %vm8_vm0, %v102_v40   ;;  %v114_v41 = vpop.permute.xlu0 %113  }
  0x8d   :  { %v126_v42 = vpop.permute.xlu1 %125   ;;  %423 = vst.msk [vmem:[%s1103_s1 + $0x9] sm:$0x1] %vm8_vm0, %v114_v41   ;;  %424 = vst.msk [vmem:[%s1103_s1 + $0x28] sm:$0x2] %vm8_vm0, %v114_v41  }
  0x8e   :  { %425 = vst.msk [vmem:[%s1103_s1 + $0x47] sm:$0x4] %vm8_vm0, %v114_v41   ;;  %426 = vst.msk [vmem:[%s1103_s1 + $0x66] sm:$0x8] %vm8_vm0, %v114_v41  }
  0x8f   :  { %427 = vst.msk [vmem:[%s1103_s1 + $0xa] sm:$0x1] %vm8_vm0, %v126_v42   ;;  %428 = vst.msk [vmem:[%s1103_s1 + $0x29] sm:$0x2] %vm8_vm0, %v126_v42  }
  0x90   :  { %429 = vst.msk [vmem:[%s1103_s1 + $0x48] sm:$0x4] %vm8_vm0, %v126_v42   ;;  %430 = vst.msk [vmem:[%s1103_s1 + $0x67] sm:$0x8] %vm8_vm0, %v126_v42   ;;  %v138_v43 = vpop.permute.xlu0 %137  }
  0x91   :  { %v150_v44 = vpop.permute.xlu1 %149   ;;  %431 = vst.msk [vmem:[%s1103_s1 + $0xb] sm:$0x1] %vm8_vm0, %v138_v43   ;;  %432 = vst.msk [vmem:[%s1103_s1 + $0x2a] sm:$0x2] %vm8_vm0, %v138_v43  }
  0x92   :  { %433 = vst.msk [vmem:[%s1103_s1 + $0x49] sm:$0x4] %vm8_vm0, %v138_v43   ;;  %434 = vst.msk [vmem:[%s1103_s1 + $0x68] sm:$0x8] %vm8_vm0, %v138_v43  }
  0x93   :  { %435 = vst.msk [vmem:[%s1103_s1 + $0xc] sm:$0x1] %vm8_vm0, %v150_v44   ;;  %436 = vst.msk [vmem:[%s1103_s1 + $0x2b] sm:$0x2] %vm8_vm0, %v150_v44  }
  0x94   :  { %437 = vst.msk [vmem:[%s1103_s1 + $0x4a] sm:$0x4] %vm8_vm0, %v150_v44   ;;  %438 = vst.msk [vmem:[%s1103_s1 + $0x69] sm:$0x8] %vm8_vm0, %v150_v44   ;;  %v162_v45 = vpop.permute.xlu0 %161  }
  0x95   :  { %v174_v46 = vpop.permute.xlu1 %173   ;;  %439 = vst.msk [vmem:[%s1103_s1 + $0xd] sm:$0x1] %vm8_vm0, %v162_v45   ;;  %440 = vst.msk [vmem:[%s1103_s1 + $0x2c] sm:$0x2] %vm8_vm0, %v162_v45  }
  0x96   :  { %441 = vst.msk [vmem:[%s1103_s1 + $0x4b] sm:$0x4] %vm8_vm0, %v162_v45   ;;  %442 = vst.msk [vmem:[%s1103_s1 + $0x6a] sm:$0x8] %vm8_vm0, %v162_v45  }
  0x97   :  { %443 = vst.msk [vmem:[%s1103_s1 + $0xe] sm:$0x1] %vm8_vm0, %v174_v46   ;;  %444 = vst.msk [vmem:[%s1103_s1 + $0x2d] sm:$0x2] %vm8_vm0, %v174_v46  }
  0x98   :  { %445 = vst.msk [vmem:[%s1103_s1 + $0x4c] sm:$0x4] %vm8_vm0, %v174_v46   ;;  %446 = vst.msk [vmem:[%s1103_s1 + $0x6b] sm:$0x8] %vm8_vm0, %v174_v46   ;;  %v186_v47 = vpop.permute.xlu0 %185  }
  0x99   :  { %v198_v48 = vpop.permute.xlu1 %197   ;;  %447 = vst.msk [vmem:[%s1103_s1 + $0xf] sm:$0x1] %vm8_vm0, %v186_v47   ;;  %448 = vst.msk [vmem:[%s1103_s1 + $0x2e] sm:$0x2] %vm8_vm0, %v186_v47  }
  0x9a   :  { %449 = vst.msk [vmem:[%s1103_s1 + $0x4d] sm:$0x4] %vm8_vm0, %v186_v47   ;;  %450 = vst.msk [vmem:[%s1103_s1 + $0x6c] sm:$0x8] %vm8_vm0, %v186_v47  }
  0x9b   :  { %451 = vst.msk [vmem:[%s1103_s1 + $0x10] sm:$0x1] %vm8_vm0, %v198_v48   ;;  %452 = vst.msk [vmem:[%s1103_s1 + $0x2f] sm:$0x2] %vm8_vm0, %v198_v48  }
  0x9c   :  { %453 = vst.msk [vmem:[%s1103_s1 + $0x4e] sm:$0x4] %vm8_vm0, %v198_v48   ;;  %454 = vst.msk [vmem:[%s1103_s1 + $0x6d] sm:$0x8] %vm8_vm0, %v198_v48   ;;  %v210_v49 = vpop.permute.xlu0 %209  }
  0x9d   :  { %v222_v50 = vpop.permute.xlu1 %221   ;;  %455 = vst.msk [vmem:[%s1103_s1 + $0x11] sm:$0x1] %vm8_vm0, %v210_v49   ;;  %456 = vst.msk [vmem:[%s1103_s1 + $0x30] sm:$0x2] %vm8_vm0, %v210_v49  }
  0x9e   :  { %457 = vst.msk [vmem:[%s1103_s1 + $0x4f] sm:$0x4] %vm8_vm0, %v210_v49   ;;  %458 = vst.msk [vmem:[%s1103_s1 + $0x6e] sm:$0x8] %vm8_vm0, %v210_v49  }
  0x9f   :  { %459 = vst.msk [vmem:[%s1103_s1 + $0x12] sm:$0x1] %vm8_vm0, %v222_v50   ;;  %460 = vst.msk [vmem:[%s1103_s1 + $0x31] sm:$0x2] %vm8_vm0, %v222_v50  }
  0xa0   :  { %461 = vst.msk [vmem:[%s1103_s1 + $0x50] sm:$0x4] %vm8_vm0, %v222_v50   ;;  %462 = vst.msk [vmem:[%s1103_s1 + $0x6f] sm:$0x8] %vm8_vm0, %v222_v50   ;;  %v234_v51 = vpop.permute.xlu0 %233  }
  0xa1   :  { %v246_v52 = vpop.permute.xlu1 %245   ;;  %463 = vst.msk [vmem:[%s1103_s1 + $0x13] sm:$0x1] %vm8_vm0, %v234_v51   ;;  %464 = vst.msk [vmem:[%s1103_s1 + $0x32] sm:$0x2] %vm8_vm0, %v234_v51  }
  0xa2   :  { %465 = vst.msk [vmem:[%s1103_s1 + $0x51] sm:$0x4] %vm8_vm0, %v234_v51   ;;  %466 = vst.msk [vmem:[%s1103_s1 + $0x70] sm:$0x8] %vm8_vm0, %v234_v51  }
  0xa3   :  { %467 = vst.msk [vmem:[%s1103_s1 + $0x14] sm:$0x1] %vm8_vm0, %v246_v52   ;;  %468 = vst.msk [vmem:[%s1103_s1 + $0x33] sm:$0x2] %vm8_vm0, %v246_v52  }
  0xa4   :  { %469 = vst.msk [vmem:[%s1103_s1 + $0x52] sm:$0x4] %vm8_vm0, %v246_v52   ;;  %470 = vst.msk [vmem:[%s1103_s1 + $0x71] sm:$0x8] %vm8_vm0, %v246_v52   ;;  %v258_v53 = vpop.permute.xlu0 %257  }
  0xa5   :  { %v270_v54 = vpop.permute.xlu1 %269   ;;  %471 = vst.msk [vmem:[%s1103_s1 + $0x15] sm:$0x1] %vm8_vm0, %v258_v53   ;;  %472 = vst.msk [vmem:[%s1103_s1 + $0x34] sm:$0x2] %vm8_vm0, %v258_v53  }
  0xa6   :  { %473 = vst.msk [vmem:[%s1103_s1 + $0x53] sm:$0x4] %vm8_vm0, %v258_v53   ;;  %474 = vst.msk [vmem:[%s1103_s1 + $0x72] sm:$0x8] %vm8_vm0, %v258_v53  }
  0xa7   :  { %475 = vst.msk [vmem:[%s1103_s1 + $0x16] sm:$0x1] %vm8_vm0, %v270_v54   ;;  %476 = vst.msk [vmem:[%s1103_s1 + $0x35] sm:$0x2] %vm8_vm0, %v270_v54  }
  0xa8   :  { %477 = vst.msk [vmem:[%s1103_s1 + $0x54] sm:$0x4] %vm8_vm0, %v270_v54   ;;  %478 = vst.msk [vmem:[%s1103_s1 + $0x73] sm:$0x8] %vm8_vm0, %v270_v54   ;;  %v282_v55 = vpop.permute.xlu0 %281  }
  0xa9   :  { %v294_v56 = vpop.permute.xlu1 %293   ;;  %479 = vst.msk [vmem:[%s1103_s1 + $0x17] sm:$0x1] %vm8_vm0, %v282_v55   ;;  %480 = vst.msk [vmem:[%s1103_s1 + $0x36] sm:$0x2] %vm8_vm0, %v282_v55  }
  0xaa   :  { %481 = vst.msk [vmem:[%s1103_s1 + $0x55] sm:$0x4] %vm8_vm0, %v282_v55   ;;  %482 = vst.msk [vmem:[%s1103_s1 + $0x74] sm:$0x8] %vm8_vm0, %v282_v55  }
  0xab   :  { %483 = vst.msk [vmem:[%s1103_s1 + $0x18] sm:$0x1] %vm8_vm0, %v294_v56   ;;  %484 = vst.msk [vmem:[%s1103_s1 + $0x37] sm:$0x2] %vm8_vm0, %v294_v56  }
  0xac   :  { %485 = vst.msk [vmem:[%s1103_s1 + $0x56] sm:$0x4] %vm8_vm0, %v294_v56   ;;  %486 = vst.msk [vmem:[%s1103_s1 + $0x75] sm:$0x8] %vm8_vm0, %v294_v56   ;;  %v306_v57 = vpop.permute.xlu0 %305  }
  0xad   :  { %v318_v58 = vpop.permute.xlu1 %317   ;;  %487 = vst.msk [vmem:[%s1103_s1 + $0x19] sm:$0x1] %vm8_vm0, %v306_v57   ;;  %488 = vst.msk [vmem:[%s1103_s1 + $0x38] sm:$0x2] %vm8_vm0, %v306_v57  }
  0xae   :  { %489 = vst.msk [vmem:[%s1103_s1 + $0x57] sm:$0x4] %vm8_vm0, %v306_v57   ;;  %490 = vst.msk [vmem:[%s1103_s1 + $0x76] sm:$0x8] %vm8_vm0, %v306_v57  }
  0xaf   :  { %491 = vst.msk [vmem:[%s1103_s1 + $0x1a] sm:$0x1] %vm8_vm0, %v318_v58   ;;  %492 = vst.msk [vmem:[%s1103_s1 + $0x39] sm:$0x2] %vm8_vm0, %v318_v58  }
  0xb0   :  { %493 = vst.msk [vmem:[%s1103_s1 + $0x58] sm:$0x4] %vm8_vm0, %v318_v58   ;;  %494 = vst.msk [vmem:[%s1103_s1 + $0x77] sm:$0x8] %vm8_vm0, %v318_v58   ;;  %v330_v59 = vpop.permute.xlu0 %329  }
  0xb1   :  { %v342_v60 = vpop.permute.xlu1 %341   ;;  %495 = vst.msk [vmem:[%s1103_s1 + $0x1b] sm:$0x1] %vm8_vm0, %v330_v59   ;;  %496 = vst.msk [vmem:[%s1103_s1 + $0x3a] sm:$0x2] %vm8_vm0, %v330_v59  }
  0xb2   :  { %497 = vst.msk [vmem:[%s1103_s1 + $0x59] sm:$0x4] %vm8_vm0, %v330_v59   ;;  %498 = vst.msk [vmem:[%s1103_s1 + $0x78] sm:$0x8] %vm8_vm0, %v330_v59  }
  0xb3   :  { %499 = vst.msk [vmem:[%s1103_s1 + $0x1c] sm:$0x1] %vm8_vm0, %v342_v60   ;;  %500 = vst.msk [vmem:[%s1103_s1 + $0x3b] sm:$0x2] %vm8_vm0, %v342_v60  }
  0xb4   :  { %501 = vst.msk [vmem:[%s1103_s1 + $0x5a] sm:$0x4] %vm8_vm0, %v342_v60   ;;  %502 = vst.msk [vmem:[%s1103_s1 + $0x79] sm:$0x8] %vm8_vm0, %v342_v60   ;;  %v354_v61 = vpop.permute.xlu0 %353  }
  0xb5   :  { %v366_v62 = vpop.permute.xlu1 %365   ;;  %503 = vst.msk [vmem:[%s1103_s1 + $0x1d] sm:$0x1] %vm8_vm0, %v354_v61   ;;  %504 = vst.msk [vmem:[%s1103_s1 + $0x3c] sm:$0x2] %vm8_vm0, %v354_v61  }
  0xb6   :  { %505 = vst.msk [vmem:[%s1103_s1 + $0x5b] sm:$0x4] %vm8_vm0, %v354_v61   ;;  %506 = vst.msk [vmem:[%s1103_s1 + $0x7a] sm:$0x8] %vm8_vm0, %v354_v61  }
  0xb7   :  { %507 = vst.msk [vmem:[%s1103_s1 + $0x1e] sm:$0x1] %vm8_vm0, %v366_v62   ;;  %508 = vst.msk [vmem:[%s1103_s1 + $0x3d] sm:$0x2] %vm8_vm0, %v366_v62  }
  0xb8   :  { %509 = vst.msk [vmem:[%s1103_s1 + $0x5c] sm:$0x4] %vm8_vm0, %v366_v62   ;;  %510 = vst.msk [vmem:[%s1103_s1 + $0x7b] sm:$0x8] %vm8_vm0, %v366_v62   ;;  %v378_v63 = vpop.permute.xlu0 %377  }
  0xb9   :  { %511 = vst.msk [vmem:[%s1103_s1 + $0x1f] sm:$0x1] %vm8_vm0, %v378_v63   ;;  %512 = vst.msk [vmem:[%s1103_s1 + $0x3e] sm:$0x2] %vm8_vm0, %v378_v63  }
  0xba   :  { %513 = vst.msk [vmem:[%s1103_s1 + $0x5d] sm:$0x4] %vm8_vm0, %v378_v63   ;;  %514 = vst.msk [vmem:[%s1103_s1 + $0x7c] sm:$0x8] %vm8_vm0, %v378_v63  }

// kernel: centernet_decoder_unit_forward.3
= control target key start
LH: loop header
LB: loop body
LE: loop exit
PB: predicated region body
PF: predicated region fallthrough
CT: control target
= control target key end

     0   :  { %s1511_s12 = smov 0   ;;  %s1513_s13 = smov 0   ;;  %s1966_s0 = inlined_call_operand.vmem [shape: bf16[128,288], index: 0, kind: input, shape index: {}]   ;;  %s1967_s1 = inlined_call_operand.vmem [shape: bf16[288,512], index: 1, kind: input, shape index: {}]   ;;  %s1968_s2 = inlined_call_operand.vmem [shape: f32[128,1], index: 2, kind: input, shape index: {}]   ;;  %s1969_s3 = inlined_call_operand.vmem [shape: f32[128,512], index: 3, kind: output, shape index: {}]  }
   0x1   :  { %s1515_s14 = smov 0  }
   0x2 LB: > { %s1268_s15 = sadd.s32 4294967295, %s1488_s14   ;;  %s1528_s16 = sadd.s32 1, %s1488_s14   ;;  %s1488_s14 = sphi %s1515_s14, %s1973_s14   ;;  %s1484_s13 = sphi %s1513_s13, %s1972_s13   ;;  %s1480_s12 = sphi %s1511_s12, %s1971_s12  }
   0x3   : > { %s38_s17 = ssub.s32 %s1488_s14, %s1528_s16  ;;  %s41_s18 = sadd.s32 1, %s1484_s13 }
   0x4   : > { %p39_p0 = scmp.eq.s32.totalorder %s38_s17, 0  ;;  %p48_p1 = scmp.ne.s32.totalorder %s1484_s13, %s1480_s12 }
   0x5   : > { %p49_p2 = scmp.eq.s32.totalorder %s1488_s14, 0  ;;  %p99_p3 = scmp.eq.s32.totalorder %s1268_s15, 1 }
   0x6   : > { %s1539_s19 = scalar_select %p39_p0, %s1484_s13, %s41_s18  }
   0x7   : > { %p50_p4 = por %p49_p2, %p48_p1  ;;  %p1541_p5 = por %p99_p3, %p48_p1 }
   0x8   : > { %p1271_p6 = scmp.ge.s32.totalorder %s1488_s14, 2 }
   0xa   : > { %127 = sbr.rel (%p1271_p6) target bundleno = 37 (0x25), region = 24 }
   0xf   : > { %130 = sbr.rel (!%p50_p4) target bundleno = 37 (0x25), region = 28  ;;  %s132_s21 = sand.u32 (%p50_p4), 1, %s1484_s13  }
  0x10   : > { %s1349_s22 = sshll.u32 (%p50_p4), %s1488_s14, 3  ;;  %s1351_s23 = smul.u32 (%p50_p4), 288, %s132_s21 }
  0x11   : > { %s1551_s26 = scalar_lea.vmem (%p50_p4), %s1967_s1, %s1349_s22 }
  0x12   : > { %v236_v0 = vld [vmem:[%s1551_s26] sm:$0xff] (%p50_p4)  ;;  %v238_v1 = vld [vmem:[%s1551_s26 + $0x10] sm:$0xff] (%p50_p4)  ;;  %s1559_s27 = scalar_lea.vmem (%p50_p4), [#allocation2], %s1351_s23 }
  0x13   : > { %v240_v2 = vld [vmem:[%s1551_s26 + $0x20] sm:$0xff] (%p50_p4)  ;;  %v242_v3 = vld [vmem:[%s1551_s26 + $0x30] sm:$0xff] (%p50_p4)  ;;  %237 = vst [vmem:[%s1559_s27] sm:$0xff] (%p50_p4), %v236_v0  ;;  %239 = vst [vmem:[%s1559_s27 + $0x8] sm:$0xff] (%p50_p4), %v238_v1 }
  0x14   : > { %v244_v4 = vld [vmem:[%s1551_s26 + $0x40] sm:$0xff]  ;;  %v246_v5 = vld [vmem:[%s1551_s26 + $0x50] sm:$0xff]  ;;  %241 = vst [vmem:[%s1559_s27 + $0x10] sm:$0xff] %v240_v2  ;;  %243 = vst [vmem:[%s1559_s27 + $0x18] sm:$0xff] %v242_v3 }
  0x15   : > { %245 = vst [vmem:[%s1559_s27 + $0x20] sm:$0xff] %v244_v4  ;;  %247 = vst [vmem:[%s1559_s27 + $0x28] sm:$0xff] %v246_v5  ;;  %v248_v6 = vld [vmem:[%s1551_s26 + $0x60] sm:$0xff]  ;;  %v250_v7 = vld [vmem:[%s1551_s26 + $0x70] sm:$0xff] }
  0x16   : > { %v252_v8 = vld [vmem:[%s1551_s26 + $0x80] sm:$0xff]  ;;  %249 = vst [vmem:[%s1559_s27 + $0x30] sm:$0xff] %v248_v6  ;;  %251 = vst [vmem:[%s1559_s27 + $0x38] sm:$0xff] %v250_v7  ;;  %v254_v9 = vld [vmem:[%s1551_s26 + $0x90] sm:$0xff] }
  0x17   : > { %253 = vst [vmem:[%s1559_s27 + $0x40] sm:$0xff] %v252_v8  ;;  %v256_v10 = vld [vmem:[%s1551_s26 + $0xa0] sm:$0xff]  ;;  %v258_v11 = vld [vmem:[%s1551_s26 + $0xb0] sm:$0xff]  ;;  %255 = vst [vmem:[%s1559_s27 + $0x48] sm:$0xff] %v254_v9 }
  0x18   : > { %257 = vst [vmem:[%s1559_s27 + $0x50] sm:$0xff] %v256_v10  ;;  %259 = vst [vmem:[%s1559_s27 + $0x58] sm:$0xff] %v258_v11  ;;  %v260_v12 = vld [vmem:[%s1551_s26 + $0xc0] sm:$0xff]  ;;  %v262_v13 = vld [vmem:[%s1551_s26 + $0xd0] sm:$0xff] }
  0x19   : > { %v264_v14 = vld [vmem:[%s1551_s26 + $0xe0] sm:$0xff]  ;;  %261 = vst [vmem:[%s1559_s27 + $0x60] sm:$0xff] %v260_v12  ;;  %263 = vst [vmem:[%s1559_s27 + $0x68] sm:$0xff] %v262_v13  ;;  %v266_v15 = vld [vmem:[%s1551_s26 + $0xf0] sm:$0xff] }
  0x1a   : > { %265 = vst [vmem:[%s1559_s27 + $0x70] sm:$0xff] %v264_v14  ;;  %v268_v16 = vld [vmem:[%s1551_s26 + $0x100] sm:$0xff]  ;;  %v270_v17 = vld [vmem:[%s1551_s26 + $0x110] sm:$0xff]  ;;  %267 = vst [vmem:[%s1559_s27 + $0x78] sm:$0xff] %v266_v15 }
  0x1b   : > { %269 = vst [vmem:[%s1559_s27 + $0x80] sm:$0xff] %v268_v16  ;;  %271 = vst [vmem:[%s1559_s27 + $0x88] sm:$0xff] %v270_v17  ;;  %v272_v18 = vld [vmem:[%s1551_s26 + $0x120] sm:$0xff]  ;;  %v274_v19 = vld [vmem:[%s1551_s26 + $0x130] sm:$0xff] }
  0x1c   : > { %v276_v20 = vld [vmem:[%s1551_s26 + $0x140] sm:$0xff]  ;;  %273 = vst [vmem:[%s1559_s27 + $0x90] sm:$0xff] %v272_v18  ;;  %275 = vst [vmem:[%s1559_s27 + $0x98] sm:$0xff] %v274_v19  ;;  %v278_v21 = vld [vmem:[%s1551_s26 + $0x150] sm:$0xff] }
  0x1d   : > { %277 = vst [vmem:[%s1559_s27 + $0xa0] sm:$0xff] %v276_v20  ;;  %v280_v22 = vld [vmem:[%s1551_s26 + $0x160] sm:$0xff]  ;;  %v282_v23 = vld [vmem:[%s1551_s26 + $0x170] sm:$0xff]  ;;  %279 = vst [vmem:[%s1559_s27 + $0xa8] sm:$0xff] %v278_v21 }
  0x1e   : > { %281 = vst [vmem:[%s1559_s27 + $0xb0] sm:$0xff] %v280_v22  ;;  %283 = vst [vmem:[%s1559_s27 + $0xb8] sm:$0xff] %v282_v23  ;;  %v284_v24 = vld [vmem:[%s1551_s26 + $0x180] sm:$0xff]  ;;  %v286_v25 = vld [vmem:[%s1551_s26 + $0x190] sm:$0xff] }
  0x1f   : > { %v288_v26 = vld [vmem:[%s1551_s26 + $0x1a0] sm:$0xff]  ;;  %285 = vst [vmem:[%s1559_s27 + $0xc0] sm:$0xff] %v284_v24  ;;  %287 = vst [vmem:[%s1559_s27 + $0xc8] sm:$0xff] %v286_v25  ;;  %v290_v27 = vld [vmem:[%s1551_s26 + $0x1b0] sm:$0xff] }
  0x20   : > { %289 = vst [vmem:[%s1559_s27 + $0xd0] sm:$0xff] %v288_v26  ;;  %v292_v28 = vld [vmem:[%s1551_s26 + $0x1c0] sm:$0xff]  ;;  %v294_v29 = vld [vmem:[%s1551_s26 + $0x1d0] sm:$0xff]  ;;  %291 = vst [vmem:[%s1559_s27 + $0xd8] sm:$0xff] %v290_v27 }
  0x21   : > { %293 = vst [vmem:[%s1559_s27 + $0xe0] sm:$0xff] %v292_v28  ;;  %295 = vst [vmem:[%s1559_s27 + $0xe8] sm:$0xff] %v294_v29  ;;  %v296_v30 = vld [vmem:[%s1551_s26 + $0x1e0] sm:$0xff]  ;;  %v298_v31 = vld [vmem:[%s1551_s26 + $0x1f0] sm:$0xff] }
  0x22   : > { %v300_v32 = vld [vmem:[%s1551_s26 + $0x200] sm:$0xff]  ;;  %297 = vst [vmem:[%s1559_s27 + $0xf0] sm:$0xff] %v296_v30  ;;  %299 = vst [vmem:[%s1559_s27 + $0xf8] sm:$0xff] %v298_v31  ;;  %v302_v33 = vld [vmem:[%s1551_s26 + $0x210] sm:$0xff] }
  0x23   : > { %301 = vst [vmem:[%s1559_s27 + $0x100] sm:$0xff] %v300_v32  ;;  %v304_v34 = vld [vmem:[%s1551_s26 + $0x220] sm:$0xff]  ;;  %v306_v35 = vld [vmem:[%s1551_s26 + $0x230] sm:$0xff]  ;;  %303 = vst [vmem:[%s1559_s27 + $0x108] sm:$0xff] %v302_v33 }
  0x24   : > { %305 = vst [vmem:[%s1559_s27 + $0x110] sm:$0xff] %v304_v34  ;;  %307 = vst [vmem:[%s1559_s27 + $0x118] sm:$0xff] %v306_v35 }
  0x25 PF: > { %p1274_p7 = scmp.ge.s32.totalorder %s1488_s14, 1  ;;  %p312_p8 = scmp.lt.s32.totalorder %s1488_s14, 3 }
  0x27   : > { %p313_p9 = pnand %p1274_p7, %p312_p8 }
  0x28   : > { %s319_s28 = sand.u32 (!%p313_p9), 1, %s1480_s12  }
  0x29   : > { %316 = sbr.rel (%p313_p9) target bundleno = 383 (0x17f), region = 66 }
  0x2a   : > { %s1352_s29 = smul.u32 (!%p313_p9), 288, %s319_s28 }
  0x2c   : > { %s1638_s5 = scalar_lea.vmem (!%p313_p9), [#allocation2], %s1352_s29 }
  0x2e   : > { %v1490_v36 = vmov 0   ;;  %v1437_v37 = vld [vmem:[%s1966_s0 + $0x4] ss:$12 sps:$4 sm:$0xff]   ;;  %v1380_v38 = vld [vmem:[%s1638_s5 + $0x74] ss:$8 sps:$4 sm:$0xff]   ;;  %vm808_vm0 = vcmask 261120  }
  0x2f   : > { %978 = vmatprep.mubr.bf16.mxu1 %v1490_v36  ;;  %1378 = vset.pattern.permute.xlu0 %v1490_v36  ;;  %v1382_v39 = vld [vmem:[%s1638_s5 + $0x70] ss:$8 sps:$4 sm:$0xff]   ;;  %v1383_v40 = vld [vmem:[%s1638_s5 + $0x64] ss:$8 sps:$4 sm:$0xff]   ;;  %v1385_v41 = vld [vmem:[%s1638_s5 + $0x60] ss:$8 sps:$4 sm:$0xff]  }
  0x30   : > { %1379 = vset.pattern.permute.xlu1 %v1490_v36  ;;  %865 = vmatprep.mubr.bf16.mxu0 %v1437_v37  ;;  %v1386_v42 = vld [vmem:[%s1638_s5 + $0x54] ss:$8 sps:$4 sm:$0xff]   ;;  %v1388_v43 = vld [vmem:[%s1638_s5 + $0x50] ss:$8 sps:$4 sm:$0xff]   ;;  %v1389_v44 = vld [vmem:[%s1638_s5 + $0x44] ss:$8 sps:$4 sm:$0xff]  }
  0x31   : > { %833 = vmatprep.subr.bf16.mxu0 %v1380_v38  ;;  %v1391_v45 = vld [vmem:[%s1638_s5 + $0x40] ss:$8 sps:$4 sm:$0xff]   ;;  %v1392_v46 = vld [vmem:[%s1638_s5 + $0x34] ss:$8 sps:$4 sm:$0xff]   ;;  %v1394_v47 = vld [vmem:[%s1638_s5 + $0x30] ss:$8 sps:$4 sm:$0xff]  }
  0x32   : > { %834 = vmatpush1.bf16.msra.mxu0 %v1382_v39  ;;  %v1395_v48 = vld [vmem:[%s1638_s5 + $0x24] ss:$8 sps:$4 sm:$0xff]   ;;  %v1397_v49 = vld [vmem:[%s1638_s5 + $0x20] ss:$8 sps:$4 sm:$0xff]   ;;  %v1421_v50 = vld [vmem:[%s1638_s5 + $0x114] ss:$8 sps:$4 sm:$0xff]  }
  0x33   : > { %835 = vmatprep.subr.bf16.mxu0 %v1383_v40  ;;  %v1424_v51 = vld [vmem:[%s1638_s5 + $0x110] ss:$8 sps:$4 sm:$0xff]   ;;  %v1398_v52 = vld [vmem:[%s1638_s5 + $0x14] ss:$8 sps:$4 sm:$0xff]   ;;  %958 = vmatprep.subr.bf16.mxu1 %v1421_v50  ;;  %v1427_v53 = vld [vmem:[%s1638_s5 + $0x104] ss:$8 sps:$4 sm:$0xff]  }
  0x34   : > { %959 = vmatpush1.bf16.msra.mxu1 %v1424_v51  ;;  %v1430_v54 = vld [vmem:[%s1638_s5 + $0x100] ss:$8 sps:$4 sm:$0xff]   ;;  %v1400_v55 = vld [vmem:[%s1638_s5 + $0x10] ss:$8 sps:$4 sm:$0xff]   ;;  %v1401_v56 = vld [vmem:[%s1638_s5 + $0x4] ss:$8 sps:$4 sm:$0xff]  }
  0x35   : > { %960 = vmatprep.subr.bf16.mxu1 %v1427_v53  ;;  %v1433_v57 = vld [vmem:[%s1966_s0 + $0x8] ss:$12 sps:$4 sm:$0xff]   ;;  %v1406_v60 = vld [vmem:[%s1638_s5 + $0xf0] ss:$8 sps:$4 sm:$0xff]   ;;  %v1407_v61 = vld [vmem:[%s1638_s5 + $0xe4] ss:$8 sps:$4 sm:$0xff]  }
  0x36   : > { %836 = vmatpush1.bf16.msra.mxu0 %v1385_v41  ;;  %v1403_v58 = vld [vmem:[%s1638_s5] ss:$8 sps:$4 sm:$0xff]   ;;  %v1404_v59 = vld [vmem:[%s1638_s5 + $0xf4] ss:$8 sps:$4 sm:$0xff]   ;;  %v1412_v1 = vld [vmem:[%s1638_s5 + $0xd0] ss:$8 sps:$4 sm:$0xff]  }
  0x37   : > { %837 = vmatprep.subr.bf16.mxu0 %v1386_v42  ;;  %v1438_v62 = vld [vmem:[%s1966_s0 + $0x20] ss:$12 sps:$4 sm:$0xff]   ;;  %v1410_v0 = vld [vmem:[%s1638_s5 + $0xd4] ss:$8 sps:$4 sm:$0xff]   ;;  %v1442_v5 = vld [vmem:[%s1966_s0 + $0x38] ss:$12 sps:$4 sm:$0xff]  }
  0x38   : > { %961 = vmatpush1.bf16.msra.mxu1 %v1430_v54  ;;  %v1409_v63 = vld [vmem:[%s1638_s5 + $0xe0] ss:$8 sps:$4 sm:$0xff]   ;;  %v414_v3 = vld [vmem:[%s1968_s2 + $0x10] sm:$0xff]  ;;  %v1413_v4 = vld [vmem:[%s1638_s5 + $0xc4] ss:$8 sps:$4 sm:$0xff]   ;;  %s1350_s12 = sshll.u32 (%p1541_p5), %s1268_s15, 4 }
  0x39   : > { %v412_v2 = vld [vmem:[%s1968_s2] sm:$0xff]  ;;  %v413_v6 = vld [vmem:[%s1968_s2 + $0x8] sm:$0xff]  ;;  %440 = vperm.xlu1 %1379, %v414_v3   ;;  %v415_v7 = vld [vmem:[%s1968_s2 + $0x18] sm:$0xff]  ;;  %s1893_s20 = scalar_lea.vmem (%p1541_p5), %s1969_s3, %s1350_s12 }
  0x3a   : > { %838 = vmatpush1.bf16.msra.mxu0 %v1388_v43  ;;  %430 = vperm.xlu0 %1378, %v412_v2   ;;  %v1415_v8 = vld [vmem:[%s1638_s5 + $0xc0] ss:$8 sps:$4 sm:$0xff]   ;;  %v1416_v9 = vld [vmem:[%s1638_s5 + $0xb4] ss:$8 sps:$4 sm:$0xff]   ;;  %v1418_v12 = vld [vmem:[%s1638_s5 + $0xb0] ss:$8 sps:$4 sm:$0xff]  }
  0x3b   : > { %839 = vmatprep.subr.bf16.mxu0 %v1389_v44  ;;  %1336 = vmatmul.mubr.msk.bf16.vlgmr.msra.gmra.mxu1 %vm808_vm0, %v1433_v57  ;;  %v416_v10 = vld [vmem:[%s1968_s2 + $0x20] sm:$0xff]  ;;  %v417_v11 = vld [vmem:[%s1968_s2 + $0x28] sm:$0xff]  ;;  %v1446_v14 = vld [vmem:[%s1966_s0 + $0x50] ss:$12 sps:$4 sm:$0xff]  }
  0x3c   : > { %988 = vmatprep.mubr.bf16.mxu1 %v1490_v36  ;;  %v1419_v13 = vld [vmem:[%s1638_s5 + $0xa4] ss:$8 sps:$4 sm:$0xff]   ;;  %v418_v15 = vld [vmem:[%s1968_s2 + $0x30] sm:$0xff]  ;;  %v419_v16 = vld [vmem:[%s1968_s2 + $0x38] sm:$0xff] }
  0x3d   : > { %445 = vperm.xlu1 %1379, %v415_v7   ;;  %v1423_v17 = vld [vmem:[%s1638_s5 + $0xa0] ss:$8 sps:$4 sm:$0xff]   ;;  %v1425_v18 = vld [vmem:[%s1638_s5 + $0x94] ss:$8 sps:$4 sm:$0xff]   ;;  %v1429_v21 = vld [vmem:[%s1638_s5 + $0x90] ss:$8 sps:$4 sm:$0xff]  }
  0x3e   : > { %840 = vmatpush1.bf16.msra.mxu0 %v1391_v45  ;;  %435 = vperm.xlu0 %1378, %v413_v6   ;;  %v420_v19 = vld [vmem:[%s1968_s2 + $0x40] sm:$0xff]  ;;  %v421_v20 = vld [vmem:[%s1968_s2 + $0x48] sm:$0xff]  ;;  %v422_v24 = vld [vmem:[%s1968_s2 + $0x50] sm:$0xff] }
  0x3f   : > { %841 = vmatprep.subr.bf16.mxu0 %v1392_v46  ;;  %v1431_v22 = vld [vmem:[%s1638_s5 + $0x84] ss:$8 sps:$4 sm:$0xff]   ;;  %v1450_v23 = vld [vmem:[%s1966_s0 + $0x68] ss:$12 sps:$4 sm:$0xff]   ;;  %v423_v25 = vld [vmem:[%s1968_s2 + $0x58] sm:$0xff] }
  0x40   : > { %v1434_v26 = vld [vmem:[%s1638_s5 + $0x80] ss:$8 sps:$4 sm:$0xff]   ;;  %v426_v32 = vld [vmem:[%s1968_s2 + $0x70] sm:$0xff]  ;;  %v427_v33 = vld [vmem:[%s1968_s2 + $0x78] sm:$0xff]  ;;  %s1275_s5 = sshll.u32 %s319_s28, 8 }
  0x41   : > { %455 = vperm.xlu1 %1379, %v417_v11   ;;  %v424_v27 = vld [vmem:[%s1968_s2 + $0x60] sm:$0xff]  ;;  %v425_v29 = vld [vmem:[%s1968_s2 + $0x68] sm:$0xff]  ;;  %v1445_v38 = vld [vmem:[%s1966_s0 + $0x30] ss:$12 sps:$4 sm:$0xff]   ;;  %s1826_s10 = scalar_lea.vmem [#allocation3], %s1275_s5 }
  0x42   : > { %842 = vmatpush1.bf16.msra.mxu0 %v1394_v47  ;;  %450 = vperm.xlu0 %1378, %v416_v10   ;;  %v1435_v28 = vld [vmem:[%s1966_s0] ss:$12 sps:$4 sm:$0xff]   ;;  %v1439_v30 = vld [vmem:[%s1966_s0 + $0x1c] ss:$12 sps:$4 sm:$0xff]   ;;  %v1441_v34 = vld [vmem:[%s1966_s0 + $0x18] ss:$12 sps:$4 sm:$0xff]  }
  0x43   : > { %843 = vmatprep.subr.bf16.mxu0 %v1395_v48  ;;  %1337 = vmatmul.mubr.msk.bf16.gmra.mxu1 %vm808_vm0, %v1438_v62  ;;  %v1454_v31 = vld [vmem:[%s1966_s0 + $0x80] ss:$12 sps:$4 sm:$0xff]   ;;  %v1458_v37 = vld [vmem:[%s1966_s0 + $0x98] ss:$12 sps:$4 sm:$0xff]   ;;  %v1462_v40 = vld [vmem:[%s1966_s0 + $0xb0] ss:$12 sps:$4 sm:$0xff]  }
  0x44   : > { %998 = vmatprep.mubr.bf16.mxu1 %v1490_v36  ;;  %v1443_v35 = vld [vmem:[%s1966_s0 + $0x34] ss:$12 sps:$4 sm:$0xff]   ;;  %v1447_v39 = vld [vmem:[%s1966_s0 + $0x4c] ss:$12 sps:$4 sm:$0xff]   ;;  %v1455_v43 = vld [vmem:[%s1966_s0 + $0x7c] ss:$12 sps:$4 sm:$0xff]  }
  0x45   : > { %465 = vperm.xlu1 %1379, %v419_v16   ;;  %v1449_v41 = vld [vmem:[%s1966_s0 + $0x48] ss:$12 sps:$4 sm:$0xff]   ;;  %v1453_v42 = vld [vmem:[%s1966_s0 + $0x60] ss:$12 sps:$4 sm:$0xff]   ;;  %v1457_v44 = vld [vmem:[%s1966_s0 + $0x78] ss:$12 sps:$4 sm:$0xff]  }
  0x46   : > { %844 = vmatpush1.bf16.msra.mxu0 %v1397_v49  ;;  %460 = vperm.xlu0 %1378, %v418_v15   ;;  %v1459_v45 = vld [vmem:[%s1966_s0 + $0x94] ss:$12 sps:$4 sm:$0xff]   ;;  %v1461_v46 = vld [vmem:[%s1966_s0 + $0x90] ss:$12 sps:$4 sm:$0xff]   ;;  %v1463_v47 = vld [vmem:[%s1966_s0 + $0xac] ss:$12 sps:$4 sm:$0xff]  }
  0x47   : > { %845 = vmatprep.subr.bf16.mxu0 %v1398_v52  ;;  %v1465_v48 = vld [vmem:[%s1966_s0 + $0xa8] ss:$12 sps:$4 sm:$0xff]  }
  0x49   : > { %475 = vperm.xlu1 %1379, %v421_v20  }
  0x4a   : > { %846 = vmatpush1.bf16.msra.mxu0 %v1400_v55  ;;  %470 = vperm.xlu0 %1378, %v420_v19  }
  0x4b   : > { %847 = vmatprep.subr.bf16.mxu0 %v1401_v56  ;;  %1338 = vmatmul.mubr.msk.bf16.gmra.mxu1 %vm808_vm0, %v1442_v5 }
  0x4c   : > { %1008 = vmatprep.mubr.bf16.mxu1 %v1490_v36 }
  0x4d   : > { %485 = vperm.xlu1 %1379, %v423_v25  }
  0x4e   : > { %848 = vmatpush1.bf16.msra.mxu0 %v1403_v58  ;;  %480 = vperm.xlu0 %1378, %v422_v24  }
  0x4f   : > { %849 = vmatprep.subr.bf16.mxu0 %v1404_v59 }
  0x51   : > { %495 = vperm.xlu1 %1379, %v425_v29  }
  0x52   : > { %850 = vmatpush2.bf16.msra.mxu0 %v1406_v60  ;;  %490 = vperm.xlu0 %1378, %v424_v27  }
  0x53   : > { %851 = vmatprep.subr.bf16.mxu0 %v1407_v61  ;;  %1339 = vmatmul.mubr.msk.bf16.gmra.mxu1 %vm808_vm0, %v1446_v14 }
  0x54   : > { %1018 = vmatprep.mubr.bf16.mxu1 %v1490_v36 }
  0x55   : > { %505 = vperm.xlu1 %1379, %v427_v33  }
  0x56   : > { %852 = vmatpush2.bf16.msra.mxu0 %v1409_v63  ;;  %500 = vperm.xlu0 %1378, %v426_v32  }
  0x57   : > { %853 = vmatprep.subr.bf16.mxu0 %v1410_v0 }
  0x5a   : > { %854 = vmatpush2.bf16.msra.mxu0 %v1412_v1 }
  0x5b   : > { %855 = vmatprep.subr.bf16.mxu0 %v1413_v4  ;;  %1340 = vmatmul.mubr.msk.bf16.gmra.mxu1 %vm808_vm0, %v1450_v23 }
  0x5c   : > { %1028 = vmatprep.mubr.bf16.mxu1 %v1490_v36 }
  0x5e   : > { %856 = vmatpush2.bf16.msra.mxu0 %v1415_v8 }
  0x5f   : > { %857 = vmatprep.subr.bf16.mxu0 %v1416_v9 }
  0x62   : > { %858 = vmatpush2.bf16.msra.mxu0 %v1418_v12 }
  0x63   : > { %859 = vmatprep.subr.bf16.mxu0 %v1419_v13  ;;  %1341 = vmatmul.mubr.msk.bf16.gmra.mxu1 %vm808_vm0, %v1454_v31 }
  0x64   : > { %1038 = vmatprep.mubr.bf16.mxu1 %v1490_v36 }
  0x66   : > { %860 = vmatpush2.bf16.msra.mxu0 %v1423_v17 }
  0x67   : > { %861 = vmatprep.subr.bf16.mxu0 %v1425_v18 }
  0x6a   : > { %862 = vmatpush2.bf16.msra.mxu0 %v1429_v21 }
  0x6b   : > { %863 = vmatprep.subr.bf16.mxu0 %v1431_v22  ;;  %1342 = vmatmul.mubr.msk.bf16.gmra.mxu1 %vm808_vm0, %v1458_v37 }
  0x6c   : > { %1048 = vmatprep.mubr.bf16.mxu1 %v1490_v36  ;;  %v1451_v36 = vld [vmem:[%s1966_s0 + $0x64] ss:$12 sps:$4 sm:$0xff]  }
  0x6e   : > { %864 = vmatpush2.bf16.msra.mxu0 %v1434_v26 }
  0x71   : > { %866 = vmatmul.mubr.bf16.vlgmr.msra.gmra.mxu0 %v1435_v28 }
  0x72   : > { %875 = vmatprep.mubr.bf16.mxu0 %v1439_v30 }
  0x73   : > { %1343 = vmatmul.mubr.msk.bf16.gmra.mxu1 %vm808_vm0, %v1462_v40 }
  0x79   : > { %876 = vmatmul.mubr.bf16.gmra.mxu0 %v1441_v34 }
  0x7a   : > { %885 = vmatprep.mubr.bf16.mxu0 %v1443_v35 }
  0x81   : > { %886 = vmatmul.mubr.bf16.gmra.mxu0 %v1445_v38 }
  0x82   : > { %895 = vmatprep.mubr.bf16.mxu0 %v1447_v39 }
  0x89   : > { %896 = vmatmul.mubr.bf16.gmra.mxu0 %v1449_v41 }
  0x8a   : > { %905 = vmatprep.mubr.bf16.mxu0 %v1451_v36 }
  0x91   : > { %906 = vmatmul.mubr.bf16.gmra.mxu0 %v1453_v42 }
  0x92   : > { %915 = vmatprep.mubr.bf16.mxu0 %v1455_v43 }
  0x99   : > { %916 = vmatmul.mubr.bf16.gmra.mxu0 %v1457_v44 }
  0x9a   : > { %925 = vmatprep.mubr.bf16.mxu0 %v1459_v45 }
  0xa1   : > { %926 = vmatmul.mubr.bf16.gmra.mxu0 %v1461_v46 }
  0xa2   : > { %935 = vmatprep.mubr.bf16.mxu0 %v1463_v47 }
  0xa9   : > { %936 = vmatmul.mubr.bf16.gmra.mxu0 %v1465_v48 }
  0xb4   : > { %v441_v13 = vpop.permute.xlu1 %440 }
  0xb5   : > { %v431_v63 = vpop.permute.xlu0 %430 }
  0xb8   : > { %v446_v26 = vpop.permute.xlu1 %445 }
  0xb9   : > { %v436_v5 = vpop.permute.xlu0 %435 }
  0xbc   : > { %v456_v44 = vpop.permute.xlu1 %455 }
  0xbd   : > { %v451_v37 = vpop.permute.xlu0 %450 }
  0xfb   : > { %v980_v49 = vpop.f32.mrf.mxu1 }
  0xfd   : > { %v982_v50 = vpop.f32.mrf.mxu1 }
  0xff   : > { %v984_v51 = vpop.f32.mrf.mxu1 }
 0x101   : > { %v986_v52 = vpop.f32.mrf.mxu1 }
 0x103   : > { %v990_v53 = vpop.f32.mrf.mxu1 }
 0x105   : > { %v992_v54 = vpop.f32.mrf.mxu1 }
 0x107   : > { %v994_v55 = vpop.f32.mrf.mxu1 }
 0x109   : > { %v996_v56 = vpop.f32.mrf.mxu1 }
 0x10b   : > { %v1000_v57 = vpop.f32.mrf.mxu1 }
 0x10d   : > { %v1808_v58 = vpop.f32.mrf.mxu1 }
 0x10f   : > { %v1810_v59 = vpop.f32.mrf.mxu1 }
 0x111   : > { %v1812_v60 = vpop.f32.mrf.mxu1 }
 0x113   : > { %v1814_v61 = vpop.f32.mrf.mxu1 }
 0x115   : > { %v1816_v62 = vpop.f32.mrf.mxu1 }
 0x117   : > { %v1818_v0 = vpop.f32.mrf.mxu1 }
 0x119   : > { %v1820_v2 = vpop.f32.mrf.mxu1 }
 0x11b   : > { %v1824_v9 = vpop.f32.mrf.mxu1 }
 0x11d   : > { %v1829_v19 = vpop.f32.mrf.mxu1 }
 0x11f   : > { %v1833_v29 = vpop.f32.mrf.mxu1 }
 0x121   : > { %v1837_v40 = vpop.f32.mrf.mxu1 }
 0x131   : > { %v867_v1 = vpop.f32.mrf.mxu0 }
 0x132   : > { %v868_v3 = vadd.f32 %v867_v1, %v431_v63 }
 0x133   : > { %v869_v4 = vpop.f32.mrf.mxu0 }
 0x134   : > { %v981_v6 = vadd.f32 %v980_v49, %v868_v3  ;;  %v870_v7 = vadd.f32 %v869_v4, %v431_v63  ;;  %v1841_v49 = vpop.f32.mrf.mxu1 }
 0x135   : > { %v871_v8 = vpop.f32.mrf.mxu0 }
 0x136   : > { %v1059_v10 = vmax.f32 %v981_v6, 0.0  ;;  %v983_v11 = vadd.f32 %v982_v50, %v870_v7  ;;  %v872_v12 = vadd.f32 %v871_v8, %v436_v5  ;;  %v1847_v1 = vpop.f32.mrf.mxu1  ;;  %v466_v6 = vpop.permute.xlu1 %465 }
 0x137   : > { %v873_v14 = vpop.f32.mrf.mxu0 }
 0x138   : > { %1091 = vst [vmem:[%s1826_s10] sm:$0xff] %v1059_v10  ;;  %v1060_v15 = vmax.f32 %v983_v11, 0.0  ;;  %v985_v16 = vadd.f32 %v984_v51, %v872_v12  ;;  %v874_v17 = vadd.f32 %v873_v14, %v436_v5  ;;  %v1034_v11 = vpop.f32.mrf.mxu1 }
 0x139   : > { %v877_v18 = vpop.f32.mrf.mxu0 }
 0x13a   : > { %1092 = vst [vmem:[%s1826_s10 + $0x8] sm:$0xff] %v1060_v15  ;;  %v1061_v20 = vmax.f32 %v985_v16, 0.0  ;;  %v987_v21 = vadd.f32 %v986_v52, %v874_v17  ;;  %v878_v22 = vadd.f32 %v877_v18, %v441_v13 }
 0x13b   : > { %v879_v23 = vpop.f32.mrf.mxu0 }
 0x13c   : > { %1093 = vst [vmem:[%s1826_s10 + $0x10] sm:$0xff] %v1061_v20  ;;  %v1062_v24 = vmax.f32 %v987_v21, 0.0  ;;  %v991_v25 = vadd.f32 %v990_v53, %v878_v22  ;;  %v880_v27 = vadd.f32 %v879_v23, %v441_v13 }
 0x13d   : > { %v881_v28 = vpop.f32.mrf.mxu0 }
 0x13e   : > { %1094 = vst [vmem:[%s1826_s10 + $0x18] sm:$0xff] %v1062_v24  ;;  %v1063_v30 = vmax.f32 %v991_v25, 0.0  ;;  %v993_v31 = vadd.f32 %v992_v54, %v880_v27  ;;  %v882_v32 = vadd.f32 %v881_v28, %v446_v26  ;;  %v461_v54 = vpop.permute.xlu0 %460 }
 0x13f   : > { %v883_v33 = vpop.f32.mrf.mxu0 }
 0x140   : > { %1095 = vst [vmem:[%s1826_s10 + $0x20] sm:$0xff] %v1063_v30  ;;  %v1064_v34 = vmax.f32 %v993_v31, 0.0  ;;  %v995_v35 = vadd.f32 %v994_v55, %v882_v32  ;;  %v884_v38 = vadd.f32 %v883_v33, %v446_v26 }
 0x141   : > { %v887_v39 = vpop.f32.mrf.mxu0 }
 0x142   : > { %1096 = vst [vmem:[%s1826_s10 + $0x28] sm:$0xff] %v1064_v34  ;;  %v1065_v41 = vmax.f32 %v995_v35, 0.0  ;;  %v997_v36 = vadd.f32 %v996_v56, %v884_v38  ;;  %v888_v42 = vadd.f32 %v887_v39, %v451_v37 }
 0x143   : > { %v889_v43 = vpop.f32.mrf.mxu0 }
 0x144   : > { %1097 = vst [vmem:[%s1826_s10 + $0x30] sm:$0xff] %v1065_v41  ;;  %v1066_v45 = vmax.f32 %v997_v36, 0.0  ;;  %v1001_v46 = vadd.f32 %v1000_v57, %v888_v42  ;;  %v890_v47 = vadd.f32 %v889_v43, %v451_v37 }
 0x145   : > { %v891_v48 = vpop.f32.mrf.mxu0 }
 0x146   : > { %1098 = vst [vmem:[%s1826_s10 + $0x38] sm:$0xff] %v1066_v45  ;;  %v1067_v50 = vmax.f32 %v1001_v46, 0.0  ;;  %v1003_v51 = vadd.f32 %v1808_v58, %v890_v47  ;;  %v892_v52 = vadd.f32 %v891_v48, %v456_v44 }
 0x147   : > { %v893_v53 = vpop.f32.mrf.mxu0 }
 0x148   : > { %1099 = vst [vmem:[%s1826_s10 + $0x40] sm:$0xff] %v1067_v50  ;;  %v1068_v55 = vmax.f32 %v1003_v51, 0.0  ;;  %v1005_v56 = vadd.f32 %v1810_v59, %v892_v52  ;;  %v894_v63 = vadd.f32 %v893_v53, %v456_v44 }
 0x149   : > { %v897_v57 = vpop.f32.mrf.mxu0 }
 0x14a   : > { %1100 = vst [vmem:[%s1826_s10 + $0x48] sm:$0xff] %v1068_v55  ;;  %v1069_v3 = vmax.f32 %v1005_v56, 0.0  ;;  %v1007_v4 = vadd.f32 %v1812_v60, %v894_v63  ;;  %v898_v5 = vadd.f32 %v897_v57, %v461_v54  ;;  %v471_v60 = vpop.permute.xlu0 %470 }
 0x14b   : > { %v899_v58 = vpop.f32.mrf.mxu0 }
 0x14c   : > { %1101 = vst [vmem:[%s1826_s10 + $0x50] sm:$0xff] %v1069_v3  ;;  %v1070_v7 = vmax.f32 %v1007_v4, 0.0  ;;  %v1011_v8 = vadd.f32 %v1814_v61, %v898_v5  ;;  %v900_v10 = vadd.f32 %v899_v58, %v461_v54  ;;  %v1036_v61 = vpop.f32.mrf.mxu1 }
 0x14d   : > { %v901_v59 = vpop.f32.mrf.mxu0 }
 0x14e   : > { %1102 = vst [vmem:[%s1826_s10 + $0x58] sm:$0xff] %v1070_v7  ;;  %v1071_v12 = vmax.f32 %v1011_v8, 0.0  ;;  %v1013_v13 = vadd.f32 %v1816_v62, %v900_v10  ;;  %v902_v14 = vadd.f32 %v901_v59, %v466_v6  ;;  %v476_v62 = vpop.permute.xlu1 %475 }
 0x14f   : > { %v903_v15 = vpop.f32.mrf.mxu0 }
 0x150   : > { %1103 = vst [vmem:[%s1826_s10 + $0x60] sm:$0xff] %v1071_v12  ;;  %v1072_v16 = vmax.f32 %v1013_v13, 0.0  ;;  %v1015_v17 = vadd.f32 %v1818_v0, %v902_v14  ;;  %v904_v18 = vadd.f32 %v903_v15, %v466_v6  ;;  %v1040_v0 = vpop.f32.mrf.mxu1 }
 0x151   : > { %v907_v20 = vpop.f32.mrf.mxu0 }
 0x152   : > { %1104 = vst [vmem:[%s1826_s10 + $0x68] sm:$0xff] %v1072_v16  ;;  %v1073_v21 = vmax.f32 %v1015_v17, 0.0  ;;  %v1017_v22 = vadd.f32 %v1820_v2, %v904_v18  ;;  %v908_v23 = vadd.f32 %v907_v20, %v471_v60  ;;  %v481_v2 = vpop.permute.xlu0 %480 }
 0x153   : > { %v909_v24 = vpop.f32.mrf.mxu0 }
 0x154   : > { %1105 = vst [vmem:[%s1826_s10 + $0x70] sm:$0xff] %v1073_v21  ;;  %v1074_v25 = vmax.f32 %v1017_v22, 0.0  ;;  %v1021_v26 = vadd.f32 %v1824_v9, %v908_v23  ;;  %v910_v27 = vadd.f32 %v909_v24, %v471_v60  ;;  %v1042_v9 = vpop.f32.mrf.mxu1 }
 0x155   : > { %v911_v28 = vpop.f32.mrf.mxu0 }
 0x156   : > { %1106 = vst [vmem:[%s1826_s10 + $0x78] sm:$0xff] %v1074_v25  ;;  %v1075_v30 = vmax.f32 %v1021_v26, 0.0  ;;  %v1023_v31 = vadd.f32 %v1829_v19, %v910_v27  ;;  %v912_v32 = vadd.f32 %v911_v28, %v476_v62  ;;  %v486_v19 = vpop.permute.xlu1 %485 }
 0x157   : > { %v913_v33 = vpop.f32.mrf.mxu0 }
 0x158   : > { %1107 = vst [vmem:[%s1826_s10 + $0x80] sm:$0xff] %v1075_v30  ;;  %v1076_v34 = vmax.f32 %v1023_v31, 0.0  ;;  %v1025_v35 = vadd.f32 %v1833_v29, %v912_v32  ;;  %v914_v37 = vadd.f32 %v913_v33, %v476_v62  ;;  %v1044_v29 = vpop.f32.mrf.mxu1 }
 0x159   : > { %v917_v38 = vpop.f32.mrf.mxu0 }
 0x15a   : > { %1108 = vst [vmem:[%s1826_s10 + $0x88] sm:$0xff] %v1076_v34  ;;  %v1077_v39 = vmax.f32 %v1025_v35, 0.0  ;;  %v1027_v41 = vadd.f32 %v1837_v40, %v914_v37  ;;  %v918_v36 = vadd.f32 %v917_v38, %v481_v2  ;;  %v491_v40 = vpop.permute.xlu0 %490  ;;  %v1046_v56 = vpop.f32.mrf.mxu1  ;;  %v1145_v37 = vld [vmem:[%s1826_s10] sm:$0xff] (%p1541_p5)  ;;  %v1147_v38 = vld [vmem:[%s1826_s10 + $0x8] sm:$0xff] (%p1541_p5) }
 0x15b   : > { %v919_v42 = vpop.f32.mrf.mxu0  ;;  %v496_v4 = vpop.permute.xlu1 %495  ;;  %1146 = vst [vmem:[%s1893_s20] sm:$0xff] (%p1541_p5), %v1145_v37  ;;  %1148 = vst [vmem:[%s1893_s20 + $0x8] sm:$0xff] (%p1541_p5), %v1147_v38 }
 0x15c   : > { %1109 = vst [vmem:[%s1826_s10 + $0x90] sm:$0xff] %v1077_v39  ;;  %v1078_v43 = vmax.f32 %v1027_v41, 0.0  ;;  %v1031_v44 = vadd.f32 %v1841_v49, %v918_v36  ;;  %v920_v45 = vadd.f32 %v919_v42, %v481_v2  ;;  %v1050_v7 = vpop.f32.mrf.mxu1  ;;  %v1151_v39 = vld [vmem:[%s1826_s10 + $0x18] sm:$0xff] (%p1541_p5)  ;;  %v1153_v41 = vld [vmem:[%s1826_s10 + $0x20] sm:$0xff] (%p1541_p5)  ;;  %v1155_v36 = vld [vmem:[%s1826_s10 + $0x28] sm:$0xff] (%p1541_p5) }
 0x15d   : > { %v921_v46 = vpop.f32.mrf.mxu0  ;;  %1152 = vst [vmem:[%s1893_s20 + $0x28] sm:$0xff] (%p1541_p5), %v1151_v39  ;;  %1154 = vst [vmem:[%s1893_s20 + $0x40] sm:$0xff] (%p1541_p5), %v1153_v41  ;;  %v1157_v42 = vld [vmem:[%s1826_s10 + $0x30] sm:$0xff] (%p1541_p5) }
 0x15e   : > { %1110 = vst [vmem:[%s1826_s10 + $0x98] sm:$0xff] %v1078_v43  ;;  %v1079_v47 = vmax.f32 %v1031_v44, 0.0  ;;  %v1033_v48 = vadd.f32 %v1847_v1, %v920_v45  ;;  %v922_v50 = vadd.f32 %v921_v46, %v486_v19  ;;  %v501_v12 = vpop.permute.xlu0 %500  ;;  %v1052_v60 = vpop.f32.mrf.mxu1  ;;  %1156 = vst [vmem:[%s1893_s20 + $0x48] sm:$0xff] (%p1541_p5), %v1155_v36  ;;  %v1161_v43 = vld [vmem:[%s1826_s10 + $0x40] sm:$0xff] (%p1541_p5)  ;;  %v1163_v44 = vld [vmem:[%s1826_s10 + $0x48] sm:$0xff] (%p1541_p5) }
 0x15f   : > { %v923_v51 = vpop.f32.mrf.mxu0  ;;  %v506_v21 = vpop.permute.xlu1 %505  ;;  %1158 = vst [vmem:[%s1893_s20 + $0x60] sm:$0xff] (%p1541_p5), %v1157_v42  ;;  %1162 = vst [vmem:[%s1893_s20 + $0x80] sm:$0xff] (%p1541_p5), %v1161_v43  ;;  %v1165_v45 = vld [vmem:[%s1826_s10 + $0x50] sm:$0xff] (%p1541_p5)  ;;  %v1167_v46 = vld [vmem:[%s1826_s10 + $0x58] sm:$0xff] (%p1541_p5) }
 0x160   : > { %1111 = vst [vmem:[%s1826_s10 + $0xa0] sm:$0xff] %v1079_v47  ;;  %v1080_v52 = vmax.f32 %v1033_v48, 0.0  ;;  %v1035_v53 = vadd.f32 %v1034_v11, %v922_v50  ;;  %v924_v54 = vadd.f32 %v923_v51, %v486_v19  ;;  %v1054_v62 = vpop.f32.mrf.mxu1  ;;  %v1159_v19 = vld [vmem:[%s1826_s10 + $0x38] sm:$0xff] (%p1541_p5)  ;;  %1164 = vst [vmem:[%s1893_s20 + $0x88] sm:$0xff] (%p1541_p5), %v1163_v44  ;;  %v1171_v47 = vld [vmem:[%s1826_s10 + $0x68] sm:$0xff] (%p1541_p5) }
 0x161   : > { %v927_v55 = vpop.f32.mrf.mxu0  ;;  %1160 = vst [vmem:[%s1893_s20 + $0x68] sm:$0xff] (%p1541_p5), %v1159_v19  ;;  %1166 = vst [vmem:[%s1893_s20 + $0xa0] sm:$0xff] (%p1541_p5), %v1165_v45  ;;  %v1173_v48 = vld [vmem:[%s1826_s10 + $0x70] sm:$0xff] (%p1541_p5)  ;;  %v1175_v50 = vld [vmem:[%s1826_s10 + $0x78] sm:$0xff] (%p1541_p5) }
 0x162   : > { %1112 = vst [vmem:[%s1826_s10 + $0xa8] sm:$0xff] %v1080_v52  ;;  %v1081_v49 = vmax.f32 %v1035_v53, 0.0  ;;  %v1037_v63 = vadd.f32 %v1036_v61, %v924_v54  ;;  %v928_v57 = vadd.f32 %v927_v55, %v491_v40  ;;  %v1056_v33 = vpop.f32.mrf.mxu1  ;;  %1168 = vst [vmem:[%s1893_s20 + $0xa8] sm:$0xff] (%p1541_p5), %v1167_v46  ;;  %v1177_v51 = vld [vmem:[%s1826_s10 + $0x80] sm:$0xff] (%p1541_p5) }
 0x163   : > { %v929_v3 = vpop.f32.mrf.mxu0  ;;  %1172 = vst [vmem:[%s1893_s20 + $0xc8] sm:$0xff] (%p1541_p5), %v1171_v47  ;;  %1174 = vst [vmem:[%s1893_s20 + $0xe0] sm:$0xff] (%p1541_p5), %v1173_v48  ;;  %v1181_v52 = vld [vmem:[%s1826_s10 + $0x90] sm:$0xff] (%p1541_p5) }
 0x164   : > { %1113 = vst [vmem:[%s1826_s10 + $0xb0] sm:$0xff] %v1081_v49  ;;  %v1082_v1 = vmax.f32 %v1037_v63, 0.0  ;;  %v1041_v5 = vadd.f32 %v1040_v0, %v928_v57  ;;  %v930_v58 = vadd.f32 %v929_v3, %v491_v40  ;;  %v1179_v40 = vld [vmem:[%s1826_s10 + $0x88] sm:$0xff] (%p1541_p5)  ;;  %1176 = vst [vmem:[%s1893_s20 + $0xe8] sm:$0xff] (%p1541_p5), %v1175_v50 }
 0x165   : > { %v931_v6 = vpop.f32.mrf.mxu0  ;;  %1178 = vst [vmem:[%s1893_s20 + $0x100] sm:$0xff] (%p1541_p5), %v1177_v51  ;;  %1180 = vst [vmem:[%s1893_s20 + $0x108] sm:$0xff] (%p1541_p5), %v1179_v40  ;;  %v1183_v53 = vld [vmem:[%s1826_s10 + $0x98] sm:$0xff] (%p1541_p5) }
 0x166   : > { %1114 = vst [vmem:[%s1826_s10 + $0xb8] sm:$0xff] %v1082_v1  ;;  %v1083_v8 = vmax.f32 %v1041_v5, 0.0  ;;  %v1043_v10 = vadd.f32 %v1042_v9, %v930_v58  ;;  %v932_v59 = vadd.f32 %v931_v6, %v496_v4  ;;  %v1149_v9 = vld [vmem:[%s1826_s10 + $0x10] sm:$0xff] (%p1541_p5)  ;;  %1182 = vst [vmem:[%s1893_s20 + $0x120] sm:$0xff] (%p1541_p5), %v1181_v52 }
 0x167   : > { %v933_v11 = vpop.f32.mrf.mxu0  ;;  %1150 = vst [vmem:[%s1893_s20 + $0x20] sm:$0xff] (%p1541_p5), %v1149_v9  ;;  %v1185_v54 = vld [vmem:[%s1826_s10 + $0xa0] sm:$0xff] (%p1541_p5)  ;;  %1184 = vst [vmem:[%s1893_s20 + $0x128] sm:$0xff] (%p1541_p5), %v1183_v53 }
 0x168   : > { %1115 = vst [vmem:[%s1826_s10 + $0xc0] sm:$0xff] %v1083_v8  ;;  %v1084_v13 = vmax.f32 %v1043_v10, 0.0  ;;  %v1045_v14 = vadd.f32 %v1044_v29, %v932_v59  ;;  %v934_v15 = vadd.f32 %v933_v11, %v496_v4  ;;  %v1169_v29 = vld [vmem:[%s1826_s10 + $0x60] sm:$0xff] (%p1541_p5)  ;;  %1186 = vst [vmem:[%s1893_s20 + $0x140] sm:$0xff] (%p1541_p5), %v1185_v54 }
 0x169   : > { %v937_v16 = vpop.f32.mrf.mxu0  ;;  %1170 = vst [vmem:[%s1893_s20 + $0xc0] sm:$0xff] (%p1541_p5), %v1169_v29  ;;  %v1187_v55 = vld [vmem:[%s1826_s10 + $0xa8] sm:$0xff] (%p1541_p5) }
 0x16a   : > { %1116 = vst [vmem:[%s1826_s10 + $0xc8] sm:$0xff] %v1084_v13  ;;  %v1085_v17 = vmax.f32 %v1045_v14, 0.0  ;;  %v1047_v18 = vadd.f32 %v1046_v56, %v934_v15  ;;  %v938_v20 = vadd.f32 %v937_v16, %v501_v12  ;;  %1188 = vst [vmem:[%s1893_s20 + $0x148] sm:$0xff] (%p1541_p5), %v1187_v55 }
 0x16b   : > { %v939_v61 = vpop.f32.mrf.mxu0  ;;  %v1189_v56 = vld [vmem:[%s1826_s10 + $0xb0] sm:$0xff] (%p1541_p5) }
 0x16c   : > { %1117 = vst [vmem:[%s1826_s10 + $0xd0] sm:$0xff] %v1085_v17  ;;  %v1086_v22 = vmax.f32 %v1047_v18, 0.0  ;;  %v1051_v23 = vadd.f32 %v1050_v7, %v938_v20  ;;  %v940_v24 = vadd.f32 %v939_v61, %v501_v12  ;;  %1190 = vst [vmem:[%s1893_s20 + $0x160] sm:$0xff] (%p1541_p5), %v1189_v56 }
 0x16d   : > { %v941_v25 = vpop.f32.mrf.mxu0  ;;  %v1191_v49 = vld [vmem:[%s1826_s10 + $0xb8] sm:$0xff] (%p1541_p5) }
 0x16e   : > { %1118 = vst [vmem:[%s1826_s10 + $0xd8] sm:$0xff] %v1086_v22  ;;  %v1087_v26 = vmax.f32 %v1051_v23, 0.0  ;;  %v1053_v27 = vadd.f32 %v1052_v60, %v940_v24  ;;  %v942_v28 = vadd.f32 %v941_v25, %v506_v21  ;;  %1192 = vst [vmem:[%s1893_s20 + $0x168] sm:$0xff] (%p1541_p5), %v1191_v49 }
 0x16f   : > { %v943_v0 = vpop.f32.mrf.mxu0  ;;  %v1193_v63 = vld [vmem:[%s1826_s10 + $0xc0] sm:$0xff] (%p1541_p5) }
 0x170   : > { %1119 = vst [vmem:[%s1826_s10 + $0xe0] sm:$0xff] %v1087_v26  ;;  %v1088_v30 = vmax.f32 %v1053_v27, 0.0  ;;  %v1055_v31 = vadd.f32 %v1054_v62, %v942_v28  ;;  %v944_v32 = vadd.f32 %v943_v0, %v506_v21  ;;  %1194 = vst [vmem:[%s1893_s20 + $0x180] sm:$0xff] (%p1541_p5), %v1193_v63 }
 0x171   : > { %v1195_v57 = vld [vmem:[%s1826_s10 + $0xc8] sm:$0xff] (%p1541_p5) }
 0x172   : > { %1120 = vst [vmem:[%s1826_s10 + $0xe8] sm:$0xff] %v1088_v30  ;;  %v1089_v2 = vmax.f32 %v1055_v31, 0.0  ;;  %v1057_v34 = vadd.f32 %v1056_v33, %v944_v32  ;;  %1129 = sbr.rel (!%p1541_p5) target bundleno = 383 (0x17f), region = 74  ;;  %1196 = vst [vmem:[%s1893_s20 + $0x188] sm:$0xff] (%p1541_p5), %v1195_v57 }
 0x173   : > { %v1197_v3 = vld [vmem:[%s1826_s10 + $0xd0] sm:$0xff] (%p1541_p5) }
 0x174   : > { %1121 = vst [vmem:[%s1826_s10 + $0xf0] sm:$0xff] %v1089_v2  ;;  %v1090_v35 = vmax.f32 %v1057_v34, 0.0  ;;  %1198 = vst [vmem:[%s1893_s20 + $0x1a0] sm:$0xff] (%p1541_p5), %v1197_v3 }
 0x175   : > { %v1199_v4 = vld [vmem:[%s1826_s10 + $0xd8] sm:$0xff] (%p1541_p5) }
 0x176   : > { %1122 = vst [vmem:[%s1826_s10 + $0xf8] sm:$0xff] %v1090_v35  ;;  %1200 = vst [vmem:[%s1893_s20 + $0x1a8] sm:$0xff] (%p1541_p5), %v1199_v4 }
 0x177   : > { %v1201_v1 = vld [vmem:[%s1826_s10 + $0xe0] sm:$0xff] }
 0x178   : > { %1202 = vst [vmem:[%s1893_s20 + $0x1c0] sm:$0xff] %v1201_v1 }
 0x179   : > { %v1203_v5 = vld [vmem:[%s1826_s10 + $0xe8] sm:$0xff] }
 0x17a   : > { %1204 = vst [vmem:[%s1893_s20 + $0x1c8] sm:$0xff] %v1203_v5 }
 0x17b   : > { %v1205_v58 = vld [vmem:[%s1826_s10 + $0xf0] sm:$0xff] }
 0x17c   : > { %1206 = vst [vmem:[%s1893_s20 + $0x1e0] sm:$0xff] %v1205_v58 }
 0x17d   : > { %v1207_v6 = vld [vmem:[%s1826_s10 + $0xf8] sm:$0xff] }
 0x17e   : > { %1208 = vst [vmem:[%s1893_s20 + $0x1e8] sm:$0xff] %v1207_v6 }
 0x17f PF: > { %p10_p10 = scmp.ge.s32.totalorder %s1528_s16, 4   ;;  %s1971_s12 = smov %s1484_s13 }
 0x180   : > { %s1972_s13 = smov %s1539_s19  ;;  %s1973_s14 = smov %s1528_s16 }
 0x181   :  { %12 = sbr.rel (!%p10_p10) target bundleno = 2 (0x2), region = 128 }

</bundles_post_ra>
